<compile_context>
chip_gen: v7x
topology: tpu7x:2x2x1
jax: 0.10.0
libtpu: 0.0.40
codegen_flags: <defaults>
</compile_context>

<pallas_src>
import functools
import math

import jax
import jax.numpy as jnp
from jax import lax
from jax.experimental import pallas as pl
from jax.experimental.pallas import tpu as pltpu


COUT = 3
CIN = 3
KSIZE = 7


def _round_up(a, b):
    return (a + b - 1) // b * b


# ----------------------------------------------------------------------------
# Gabor filter bank (pure JAX; mirrors gabor_fn in the PyTorch module)
# ----------------------------------------------------------------------------
def gabor_fn(kernel_size, channel_in, channel_out, sigma, theta, Lambda, psi, gamma):
    sigma_x = sigma
    sigma_y = sigma / gamma
    xmax = kernel_size // 2
    ymax = kernel_size // 2
    xmin, ymin = -xmax, -ymax
    ksize = xmax - xmin + 1

    y_0 = jnp.arange(ymin, ymax + 1).astype(jnp.float32)
    # y varies along the LAST dim, x along the second-to-last (as in torch code)
    y = jnp.broadcast_to(y_0.reshape(1, 1, 1, -1),
                         (channel_out, channel_in, ksize, ksize))
    x_0 = jnp.arange(xmin, xmax + 1).astype(jnp.float32)
    x = jnp.broadcast_to(x_0.reshape(1, 1, -1, 1),
                         (channel_out, channel_in, ksize, ksize))

    th = theta.reshape(-1, 1, 1, 1)
    sx = sigma_x.reshape(-1, 1, 1, 1)
    sy = sigma_y.reshape(-1, 1, 1, 1)
    lam = Lambda.reshape(-1, 1, 1, 1)
    ps = psi.reshape(-1, 1, 1, 1)

    x_theta = x * jnp.cos(th) + y * jnp.sin(th)
    y_theta = -x * jnp.sin(th) + y * jnp.cos(th)
    gb = jnp.exp(-0.5 * (x_theta ** 2 / sx ** 2 + y_theta ** 2 / sy ** 2)) * \
         jnp.cos(2.0 * math.pi / lam * x_theta + ps)
    return gb.astype(jnp.float32)


# ----------------------------------------------------------------------------
# Pallas conv2d kernel: single shared KxK filter, channel-pre-summed input
# ----------------------------------------------------------------------------
def _gabor_conv_kernel(w_ref, x_ref, o_ref, *, k):
    """Valid conv, stride 1, one shared filter, output broadcast to Cout.

    w_ref : SMEM (K*K,)            f32 -- flat taps of the shared Gabor filter
    x_ref : VMEM (H, L_in)         f32 -- channel-summed input; lane j = n*W + col
    o_ref : VMEM (Cout, Ho, L_out) f32 -- L_out multiple of 128 (lane-dense stores)
    """
    cout, ho, l_out = o_ref.shape
    acc = jnp.zeros((ho, l_out), jnp.float32)
    # 49 scalar-weight * plane FMAs on the VPU; each plane is sliced directly
    # from the ref so only acc + one plane are live (no shifted-slab spills).
    for kh in range(k):
        for kw in range(k):
            acc = acc + w_ref[kh * k + kw] * x_ref[kh:kh + ho, kw:kw + l_out]
    # Identical Gabor filter for every (co, ci) => all output channels equal.
    for co in range(cout):
        o_ref[co, :, :] = acc


def conv2d_valid_gabor_pallas(x, filt, cout=COUT):
    """x: (N,Cin,H,W) f32; filt: (K,K) shared tap grid -> (N,Cout,Ho,Wo).

    Exploits the module's scalar Gabor parameterization (identical filter for
    every (co, ci)):  out[n, co] = conv2d_valid(sum_ci x[n, ci], filt).
    TODO(synk): if params ever become per-output-channel, fall back to a
    per-co filter with the ci-sum hoist (3x collapse) instead of this 9x form.
    """
    n, cin, h, w = x.shape
    k = filt.shape[0]
    ho, wo = h - k + 1, w - k + 1
    assert ho > 0 and wo > 0

    x = x.astype(jnp.float32)
    filt = filt.astype(jnp.float32)

    # --- 9x tap collapse: pre-sum input channels (cheap XLA op, fused).
    xs = jnp.sum(x, axis=1)                                     # (N, H, W)

    # --- images per chunk from an ~8 MiB per-block budget (x2 double-buffered
    #     stays well under v7x's 64 MiB physical VMEM and our scoped limit).
    per_img_bytes = (h * w + cout * ho * w) * 4
    nb = max(1, min(n, (8 * 1024 * 1024) // max(per_img_bytes, 1)))
    g = -(-n // nb)                                             # ceil(n / nb)
    n_pad = g * nb

    nw = nb * w
    # NOTE: when nb*W < 128 (tiny batches) most lanes are padding; real
    # workloads should keep nb*W >= 128 for full VALU lane utilization.
    l_out = _round_up(nw, 128)          # lane-dense output slab per chunk
    l_in = l_out + 128                  # room for the kw in [0, K) lane shifts

    # Pack nb whole images per chunk onto the lane axis: lane j = local_n*W + c.
    xs = jnp.pad(xs, ((0, n_pad - n), (0, 0), (0, 0)))
    xs = xs.reshape(g, nb, h, w).transpose(0, 2, 1, 3).reshape(g, h, nw)
    xs = jnp.pad(xs, ((0, 0), (0, 0), (0, l_in - nw)))          # (G, H, L_in)

    w_flat = filt.reshape(-1)                                   # (K*K,) -> SMEM

    block_bytes = (h * l_in + cout * ho * l_out) * 4
    vmem_limit = int(min(48 * 2 ** 20, max(32 * 2 ** 20, 3 * block_bytes)))

    cost = pl.CostEstimate(
        flops=2 * g * ho * l_out * k * k,
        transcendentals=0,
        bytes_accessed=4 * (g * h * l_in + g * cout * ho * l_out + k * k),
    )

    out_slab = pl.pallas_call(
        functools.partial(_gabor_conv_kernel, k=k),
        out_shape=jax.ShapeDtypeStruct((g, cout, ho, l_out), jnp.float32),
        grid=(g,),
        in_specs=[
            pl.BlockSpec(memory_space=pltpu.MemorySpace.SMEM),       # 49 taps
            pl.BlockSpec((None, h, l_in), lambda i: (i, 0, 0)),      # chunk slab
        ],
        out_specs=pl.BlockSpec((None, cout, ho, l_out), lambda i: (i, 0, 0, 0)),
        compiler_params=pltpu.CompilerParams(
            dimension_semantics=("parallel",),   # v7x megacore shards chunks
            vmem_limit_bytes=vmem_limit,
        ),
        cost_estimate=cost,
    )(w_flat, xs)

    # TODO(synk): for single very large images (block > ~16 MiB) add an Ho-row
    # grid axis with a K-1 row halo in the index_map; unnecessary at these sizes.

    # Unpack lanes -> (N, Cout, Ho, Wo).
    # SAFETY: output columns c >= Wo of each packed image mix taps from the
    # next image / zero padding; they MUST be discarded here.  Any change to
    # this final slice (or adding padding>0) must keep discarding them.
    out = out_slab[:, :, :, :nw].reshape(g, cout, ho, nb, w)
    out = out.transpose(0, 3, 1, 2, 4).reshape(n_pad, cout, ho, w)
    return out[:n, :, :, :wo]


@jax.jit
def _gabor_forward(x, sigma, theta, Lambda, psi, gamma):
    # Bank is a deterministic function of the fixed module constants; it is
    # constant-folded under jit.  Filters are identical across (co, ci)
    # (verified eagerly in __init__), so only bank[0, 0] is needed.
    bank = gabor_fn(KSIZE, CIN, COUT, sigma, theta, Lambda, psi, gamma)
    return conv2d_valid_gabor_pallas(x, bank[0, 0], cout=COUT)


# ----------------------------------------------------------------------------
# GaborConv2d module equivalent
# ----------------------------------------------------------------------------
class GaborConv2d:
    def __init__(self, channel_in=3, channel_out=3, stride=1, padding=0):
        # The reference module hard-codes 3->3 channels; this Pallas port
        # implements the stride=1 / padding=0 configuration it is used with.
        assert channel_in == 3 and channel_out == 3, "GaborConv2d is hard-coded to 3->3 channels"
        assert stride == 1 and padding == 0, "Pallas path implements stride=1, padding=0 only"
        self.kernel_size = KSIZE
        self.channel_in = CIN
        self.channel_out = COUT
        self.stride = stride
        self.padding = padding
        # deterministic parameters (same constants as the PyTorch __init__)
        self.Lambda = jnp.array([math.pi / 2], jnp.float32)
        self.theta = jnp.array([math.pi / 3], jnp.float32)
        self.psi = jnp.array([math.pi / 2], jnp.float32)
        self.sigma = jnp.array([1.0], jnp.float32)
        self.gamma = jnp.array([0.5], jnp.float32)
        # NOTE: the PyTorch module defines nn.Sigmoid() but never uses it in forward.

        # One-time eager check that the scalar Gabor params really produce one
        # shared filter for all (co, ci) pairs (required by the 9x tap collapse).
        bank = gabor_fn(self.kernel_size, self.channel_in, self.channel_out,
                        self.sigma, self.theta, self.Lambda, self.psi, self.gamma)
        assert bool(jnp.all(jnp.abs(bank - bank[0:1, 0:1]) < 1e-6)), \
            "Gabor bank not identical across (co, ci); 9x tap collapse invalid."

    def __call__(self, x):
        return _gabor_forward(x, self.sigma, self.theta, self.Lambda, self.psi, self.gamma)


if __name__ == "__main__":
    key = jax.random.PRNGKey(0)
    x = jax.random.normal(key, (2, 3, 16, 16), dtype=jnp.float32)  # NCHW

    mod = GaborConv2d()
    out = jax.block_until_ready(mod(x))
    assert out.shape == (2, 3, 10, 10)

    # correctness check vs XLA reference conv (NCHW / OIHW, valid)
    bank = gabor_fn(7, 3, 3, mod.sigma, mod.theta, mod.Lambda, mod.psi, mod.gamma)
    ref = lax.conv_general_dilated(
        x, bank, window_strides=(1, 1), padding="VALID",
        dimension_numbers=("NCHW", "OIHW", "NCHW"))
    assert jnp.allclose(out, ref, atol=1e-4, rtol=1e-4), "mismatch vs reference conv"

    print("KERNEL_OK")
</pallas_src>

<mosaic_0001>
module attributes {stable_mosaic.version = 11 : i64} {
  func.func @_gabor_conv_kernel(%arg0: i32, %arg1: memref<49xf32, #tpu.memory_space<smem>>, %arg2: memref<1x16x256xf32, #tpu.memory_space<vmem>>, %arg3: memref<1x3x10x128xf32, #tpu.memory_space<vmem>>) attributes {dimension_semantics = [#tpu.dimension_semantics<parallel>], iteration_bounds = array<i64: 1>, scalar_prefetch = 0 : i64, scratch_operands = 0 : i64, tpu.core_type = #tpu.core_type<tc>, window_params = [{transform_indices = @transform_0, window_bounds = array<i64: 49>}, {transform_indices = @transform_1, window_bounds = array<i64: 1, 16, 256>}, {transform_indices = @transform_2, window_bounds = array<i64: 1, 3, 10, 128>}]} {
    %cst = arith.constant 0.000000e+00 : f32
    %0 = vector.broadcast %cst : f32 to vector<10x128xf32>
    %c0 = arith.constant 0 : index
    %1 = memref.load %arg1[%c0] : memref<49xf32, #tpu.memory_space<smem>>
    %c0_0 = arith.constant 0 : index
    %c0_1 = arith.constant 0 : index
    %c0_2 = arith.constant 0 : index
    %2 = vector.load %arg2[%c0_0, %c0_1, %c0_2] : memref<1x16x256xf32, #tpu.memory_space<vmem>>, vector<1x10x128xf32>
    %3 = vector.shape_cast %2 : vector<1x10x128xf32> to vector<10x128xf32>
    %4 = vector.broadcast %1 : f32 to vector<10x128xf32>
    %5 = arith.mulf %4, %3 : vector<10x128xf32>
    %6 = arith.addf %0, %5 : vector<10x128xf32>
    %c1 = arith.constant 1 : index
    %7 = memref.load %arg1[%c1] : memref<49xf32, #tpu.memory_space<smem>>
    %c0_3 = arith.constant 0 : index
    %c0_4 = arith.constant 0 : index
    %c1_5 = arith.constant 1 : index
    %8 = vector.load %arg2[%c0_3, %c0_4, %c1_5] : memref<1x16x256xf32, #tpu.memory_space<vmem>>, vector<1x10x128xf32>
    %9 = vector.shape_cast %8 : vector<1x10x128xf32> to vector<10x128xf32>
    %10 = vector.broadcast %7 : f32 to vector<10x128xf32>
    %11 = arith.mulf %10, %9 : vector<10x128xf32>
    %12 = arith.addf %6, %11 : vector<10x128xf32>
    %c2 = arith.constant 2 : index
    %13 = memref.load %arg1[%c2] : memref<49xf32, #tpu.memory_space<smem>>
    %c0_6 = arith.constant 0 : index
    %c0_7 = arith.constant 0 : index
    %c2_8 = arith.constant 2 : index
    %14 = vector.load %arg2[%c0_6, %c0_7, %c2_8] : memref<1x16x256xf32, #tpu.memory_space<vmem>>, vector<1x10x128xf32>
    %15 = vector.shape_cast %14 : vector<1x10x128xf32> to vector<10x128xf32>
    %16 = vector.broadcast %13 : f32 to vector<10x128xf32>
    %17 = arith.mulf %16, %15 : vector<10x128xf32>
    %18 = arith.addf %12, %17 : vector<10x128xf32>
    %c3 = arith.constant 3 : index
    %19 = memref.load %arg1[%c3] : memref<49xf32, #tpu.memory_space<smem>>
    %c0_9 = arith.constant 0 : index
    %c0_10 = arith.constant 0 : index
    %c3_11 = arith.constant 3 : index
    %20 = vector.load %arg2[%c0_9, %c0_10, %c3_11] : memref<1x16x256xf32, #tpu.memory_space<vmem>>, vector<1x10x128xf32>
    %21 = vector.shape_cast %20 : vector<1x10x128xf32> to vector<10x128xf32>
    %22 = vector.broadcast %19 : f32 to vector<10x128xf32>
    %23 = arith.mulf %22, %21 : vector<10x128xf32>
    %24 = arith.addf %18, %23 : vector<10x128xf32>
    %c4 = arith.constant 4 : index
    %25 = memref.load %arg1[%c4] : memref<49xf32, #tpu.memory_space<smem>>
    %c0_12 = arith.constant 0 : index
    %c0_13 = arith.constant 0 : index
    %c4_14 = arith.constant 4 : index
    %26 = vector.load %arg2[%c0_12, %c0_13, %c4_14] : memref<1x16x256xf32, #tpu.memory_space<vmem>>, vector<1x10x128xf32>
    %27 = vector.shape_cast %26 : vector<1x10x128xf32> to vector<10x128xf32>
    %28 = vector.broadcast %25 : f32 to vector<10x128xf32>
    %29 = arith.mulf %28, %27 : vector<10x128xf32>
    %30 = arith.addf %24, %29 : vector<10x128xf32>
    %c5 = arith.constant 5 : index
    %31 = memref.load %arg1[%c5] : memref<49xf32, #tpu.memory_space<smem>>
    %c0_15 = arith.constant 0 : index
    %c0_16 = arith.constant 0 : index
    %c5_17 = arith.constant 5 : index
    %32 = vector.load %arg2[%c0_15, %c0_16, %c5_17] : memref<1x16x256xf32, #tpu.memory_space<vmem>>, vector<1x10x128xf32>
    %33 = vector.shape_cast %32 : vector<1x10x128xf32> to vector<10x128xf32>
    %34 = vector.broadcast %31 : f32 to vector<10x128xf32>
    %35 = arith.mulf %34, %33 : vector<10x128xf32>
    %36 = arith.addf %30, %35 : vector<10x128xf32>
    %c6 = arith.constant 6 : index
    %37 = memref.load %arg1[%c6] : memref<49xf32, #tpu.memory_space<smem>>
    %c0_18 = arith.constant 0 : index
    %c0_19 = arith.constant 0 : index
    %c6_20 = arith.constant 6 : index
    %38 = vector.load %arg2[%c0_18, %c0_19, %c6_20] : memref<1x16x256xf32, #tpu.memory_space<vmem>>, vector<1x10x128xf32>
    %39 = vector.shape_cast %38 : vector<1x10x128xf32> to vector<10x128xf32>
    %40 = vector.broadcast %37 : f32 to vector<10x128xf32>
    %41 = arith.mulf %40, %39 : vector<10x128xf32>
    %42 = arith.addf %36, %41 : vector<10x128xf32>
    %c7 = arith.constant 7 : index
    %43 = memref.load %arg1[%c7] : memref<49xf32, #tpu.memory_space<smem>>
    %c0_21 = arith.constant 0 : index
    %c1_22 = arith.constant 1 : index
    %c0_23 = arith.constant 0 : index
    %44 = vector.load %arg2[%c0_21, %c1_22, %c0_23] : memref<1x16x256xf32, #tpu.memory_space<vmem>>, vector<1x10x128xf32>
    %45 = vector.shape_cast %44 : vector<1x10x128xf32> to vector<10x128xf32>
    %46 = vector.broadcast %43 : f32 to vector<10x128xf32>
    %47 = arith.mulf %46, %45 : vector<10x128xf32>
    %48 = arith.addf %42, %47 : vector<10x128xf32>
    %c8 = arith.constant 8 : index
    %49 = memref.load %arg1[%c8] : memref<49xf32, #tpu.memory_space<smem>>
    %c0_24 = arith.constant 0 : index
    %c1_25 = arith.constant 1 : index
    %c1_26 = arith.constant 1 : index
    %50 = vector.load %arg2[%c0_24, %c1_25, %c1_26] : memref<1x16x256xf32, #tpu.memory_space<vmem>>, vector<1x10x128xf32>
    %51 = vector.shape_cast %50 : vector<1x10x128xf32> to vector<10x128xf32>
    %52 = vector.broadcast %49 : f32 to vector<10x128xf32>
    %53 = arith.mulf %52, %51 : vector<10x128xf32>
    %54 = arith.addf %48, %53 : vector<10x128xf32>
    %c9 = arith.constant 9 : index
    %55 = memref.load %arg1[%c9] : memref<49xf32, #tpu.memory_space<smem>>
    %c0_27 = arith.constant 0 : index
    %c1_28 = arith.constant 1 : index
    %c2_29 = arith.constant 2 : index
    %56 = vector.load %arg2[%c0_27, %c1_28, %c2_29] : memref<1x16x256xf32, #tpu.memory_space<vmem>>, vector<1x10x128xf32>
    %57 = vector.shape_cast %56 : vector<1x10x128xf32> to vector<10x128xf32>
    %58 = vector.broadcast %55 : f32 to vector<10x128xf32>
    %59 = arith.mulf %58, %57 : vector<10x128xf32>
    %60 = arith.addf %54, %59 : vector<10x128xf32>
    %c10 = arith.constant 10 : index
    %61 = memref.load %arg1[%c10] : memref<49xf32, #tpu.memory_space<smem>>
    %c0_30 = arith.constant 0 : index
    %c1_31 = arith.constant 1 : index
    %c3_32 = arith.constant 3 : index
    %62 = vector.load %arg2[%c0_30, %c1_31, %c3_32] : memref<1x16x256xf32, #tpu.memory_space<vmem>>, vector<1x10x128xf32>
    %63 = vector.shape_cast %62 : vector<1x10x128xf32> to vector<10x128xf32>
    %64 = vector.broadcast %61 : f32 to vector<10x128xf32>
    %65 = arith.mulf %64, %63 : vector<10x128xf32>
    %66 = arith.addf %60, %65 : vector<10x128xf32>
    %c11 = arith.constant 11 : index
    %67 = memref.load %arg1[%c11] : memref<49xf32, #tpu.memory_space<smem>>
    %c0_33 = arith.constant 0 : index
    %c1_34 = arith.constant 1 : index
    %c4_35 = arith.constant 4 : index
    %68 = vector.load %arg2[%c0_33, %c1_34, %c4_35] : memref<1x16x256xf32, #tpu.memory_space<vmem>>, vector<1x10x128xf32>
    %69 = vector.shape_cast %68 : vector<1x10x128xf32> to vector<10x128xf32>
    %70 = vector.broadcast %67 : f32 to vector<10x128xf32>
    %71 = arith.mulf %70, %69 : vector<10x128xf32>
    %72 = arith.addf %66, %71 : vector<10x128xf32>
    %c12 = arith.constant 12 : index
    %73 = memref.load %arg1[%c12] : memref<49xf32, #tpu.memory_space<smem>>
    %c0_36 = arith.constant 0 : index
    %c1_37 = arith.constant 1 : index
    %c5_38 = arith.constant 5 : index
    %74 = vector.load %arg2[%c0_36, %c1_37, %c5_38] : memref<1x16x256xf32, #tpu.memory_space<vmem>>, vector<1x10x128xf32>
    %75 = vector.shape_cast %74 : vector<1x10x128xf32> to vector<10x128xf32>
    %76 = vector.broadcast %73 : f32 to vector<10x128xf32>
    %77 = arith.mulf %76, %75 : vector<10x128xf32>
    %78 = arith.addf %72, %77 : vector<10x128xf32>
    %c13 = arith.constant 13 : index
    %79 = memref.load %arg1[%c13] : memref<49xf32, #tpu.memory_space<smem>>
    %c0_39 = arith.constant 0 : index
    %c1_40 = arith.constant 1 : index
    %c6_41 = arith.constant 6 : index
    %80 = vector.load %arg2[%c0_39, %c1_40, %c6_41] : memref<1x16x256xf32, #tpu.memory_space<vmem>>, vector<1x10x128xf32>
    %81 = vector.shape_cast %80 : vector<1x10x128xf32> to vector<10x128xf32>
    %82 = vector.broadcast %79 : f32 to vector<10x128xf32>
    %83 = arith.mulf %82, %81 : vector<10x128xf32>
    %84 = arith.addf %78, %83 : vector<10x128xf32>
    %c14 = arith.constant 14 : index
    %85 = memref.load %arg1[%c14] : memref<49xf32, #tpu.memory_space<smem>>
    %c0_42 = arith.constant 0 : index
    %c2_43 = arith.constant 2 : index
    %c0_44 = arith.constant 0 : index
    %86 = vector.load %arg2[%c0_42, %c2_43, %c0_44] : memref<1x16x256xf32, #tpu.memory_space<vmem>>, vector<1x10x128xf32>
    %87 = vector.shape_cast %86 : vector<1x10x128xf32> to vector<10x128xf32>
    %88 = vector.broadcast %85 : f32 to vector<10x128xf32>
    %89 = arith.mulf %88, %87 : vector<10x128xf32>
    %90 = arith.addf %84, %89 : vector<10x128xf32>
    %c15 = arith.constant 15 : index
    %91 = memref.load %arg1[%c15] : memref<49xf32, #tpu.memory_space<smem>>
    %c0_45 = arith.constant 0 : index
    %c2_46 = arith.constant 2 : index
    %c1_47 = arith.constant 1 : index
    %92 = vector.load %arg2[%c0_45, %c2_46, %c1_47] : memref<1x16x256xf32, #tpu.memory_space<vmem>>, vector<1x10x128xf32>
    %93 = vector.shape_cast %92 : vector<1x10x128xf32> to vector<10x128xf32>
    %94 = vector.broadcast %91 : f32 to vector<10x128xf32>
    %95 = arith.mulf %94, %93 : vector<10x128xf32>
    %96 = arith.addf %90, %95 : vector<10x128xf32>
    %c16 = arith.constant 16 : index
    %97 = memref.load %arg1[%c16] : memref<49xf32, #tpu.memory_space<smem>>
    %c0_48 = arith.constant 0 : index
    %c2_49 = arith.constant 2 : index
    %c2_50 = arith.constant 2 : index
    %98 = vector.load %arg2[%c0_48, %c2_49, %c2_50] : memref<1x16x256xf32, #tpu.memory_space<vmem>>, vector<1x10x128xf32>
    %99 = vector.shape_cast %98 : vector<1x10x128xf32> to vector<10x128xf32>
    %100 = vector.broadcast %97 : f32 to vector<10x128xf32>
    %101 = arith.mulf %100, %99 : vector<10x128xf32>
    %102 = arith.addf %96, %101 : vector<10x128xf32>
    %c17 = arith.constant 17 : index
    %103 = memref.load %arg1[%c17] : memref<49xf32, #tpu.memory_space<smem>>
    %c0_51 = arith.constant 0 : index
    %c2_52 = arith.constant 2 : index
    %c3_53 = arith.constant 3 : index
    %104 = vector.load %arg2[%c0_51, %c2_52, %c3_53] : memref<1x16x256xf32, #tpu.memory_space<vmem>>, vector<1x10x128xf32>
    %105 = vector.shape_cast %104 : vector<1x10x128xf32> to vector<10x128xf32>
    %106 = vector.broadcast %103 : f32 to vector<10x128xf32>
    %107 = arith.mulf %106, %105 : vector<10x128xf32>
    %108 = arith.addf %102, %107 : vector<10x128xf32>
    %c18 = arith.constant 18 : index
    %109 = memref.load %arg1[%c18] : memref<49xf32, #tpu.memory_space<smem>>
    %c0_54 = arith.constant 0 : index
    %c2_55 = arith.constant 2 : index
    %c4_56 = arith.constant 4 : index
    %110 = vector.load %arg2[%c0_54, %c2_55, %c4_56] : memref<1x16x256xf32, #tpu.memory_space<vmem>>, vector<1x10x128xf32>
    %111 = vector.shape_cast %110 : vector<1x10x128xf32> to vector<10x128xf32>
    %112 = vector.broadcast %109 : f32 to vector<10x128xf32>
    %113 = arith.mulf %112, %111 : vector<10x128xf32>
    %114 = arith.addf %108, %113 : vector<10x128xf32>
    %c19 = arith.constant 19 : index
    %115 = memref.load %arg1[%c19] : memref<49xf32, #tpu.memory_space<smem>>
    %c0_57 = arith.constant 0 : index
    %c2_58 = arith.constant 2 : index
    %c5_59 = arith.constant 5 : index
    %116 = vector.load %arg2[%c0_57, %c2_58, %c5_59] : memref<1x16x256xf32, #tpu.memory_space<vmem>>, vector<1x10x128xf32>
    %117 = vector.shape_cast %116 : vector<1x10x128xf32> to vector<10x128xf32>
    %118 = vector.broadcast %115 : f32 to vector<10x128xf32>
    %119 = arith.mulf %118, %117 : vector<10x128xf32>
    %120 = arith.addf %114, %119 : vector<10x128xf32>
    %c20 = arith.constant 20 : index
    %121 = memref.load %arg1[%c20] : memref<49xf32, #tpu.memory_space<smem>>
    %c0_60 = arith.constant 0 : index
    %c2_61 = arith.constant 2 : index
    %c6_62 = arith.constant 6 : index
    %122 = vector.load %arg2[%c0_60, %c2_61, %c6_62] : memref<1x16x256xf32, #tpu.memory_space<vmem>>, vector<1x10x128xf32>
    %123 = vector.shape_cast %122 : vector<1x10x128xf32> to vector<10x128xf32>
    %124 = vector.broadcast %121 : f32 to vector<10x128xf32>
    %125 = arith.mulf %124, %123 : vector<10x128xf32>
    %126 = arith.addf %120, %125 : vector<10x128xf32>
    %c21 = arith.constant 21 : index
    %127 = memref.load %arg1[%c21] : memref<49xf32, #tpu.memory_space<smem>>
    %c0_63 = arith.constant 0 : index
    %c3_64 = arith.constant 3 : index
    %c0_65 = arith.constant 0 : index
    %128 = vector.load %arg2[%c0_63, %c3_64, %c0_65] : memref<1x16x256xf32, #tpu.memory_space<vmem>>, vector<1x10x128xf32>
    %129 = vector.shape_cast %128 : vector<1x10x128xf32> to vector<10x128xf32>
    %130 = vector.broadcast %127 : f32 to vector<10x128xf32>
    %131 = arith.mulf %130, %129 : vector<10x128xf32>
    %132 = arith.addf %126, %131 : vector<10x128xf32>
    %c22 = arith.constant 22 : index
    %133 = memref.load %arg1[%c22] : memref<49xf32, #tpu.memory_space<smem>>
    %c0_66 = arith.constant 0 : index
    %c3_67 = arith.constant 3 : index
    %c1_68 = arith.constant 1 : index
    %134 = vector.load %arg2[%c0_66, %c3_67, %c1_68] : memref<1x16x256xf32, #tpu.memory_space<vmem>>, vector<1x10x128xf32>
    %135 = vector.shape_cast %134 : vector<1x10x128xf32> to vector<10x128xf32>
    %136 = vector.broadcast %133 : f32 to vector<10x128xf32>
    %137 = arith.mulf %136, %135 : vector<10x128xf32>
    %138 = arith.addf %132, %137 : vector<10x128xf32>
    %c23 = arith.constant 23 : index
    %139 = memref.load %arg1[%c23] : memref<49xf32, #tpu.memory_space<smem>>
    %c0_69 = arith.constant 0 : index
    %c3_70 = arith.constant 3 : index
    %c2_71 = arith.constant 2 : index
    %140 = vector.load %arg2[%c0_69, %c3_70, %c2_71] : memref<1x16x256xf32, #tpu.memory_space<vmem>>, vector<1x10x128xf32>
    %141 = vector.shape_cast %140 : vector<1x10x128xf32> to vector<10x128xf32>
    %142 = vector.broadcast %139 : f32 to vector<10x128xf32>
    %143 = arith.mulf %142, %141 : vector<10x128xf32>
    %144 = arith.addf %138, %143 : vector<10x128xf32>
    %c24 = arith.constant 24 : index
    %145 = memref.load %arg1[%c24] : memref<49xf32, #tpu.memory_space<smem>>
    %c0_72 = arith.constant 0 : index
    %c3_73 = arith.constant 3 : index
    %c3_74 = arith.constant 3 : index
    %146 = vector.load %arg2[%c0_72, %c3_73, %c3_74] : memref<1x16x256xf32, #tpu.memory_space<vmem>>, vector<1x10x128xf32>
    %147 = vector.shape_cast %146 : vector<1x10x128xf32> to vector<10x128xf32>
    %148 = vector.broadcast %145 : f32 to vector<10x128xf32>
    %149 = arith.mulf %148, %147 : vector<10x128xf32>
    %150 = arith.addf %144, %149 : vector<10x128xf32>
    %c25 = arith.constant 25 : index
    %151 = memref.load %arg1[%c25] : memref<49xf32, #tpu.memory_space<smem>>
    %c0_75 = arith.constant 0 : index
    %c3_76 = arith.constant 3 : index
    %c4_77 = arith.constant 4 : index
    %152 = vector.load %arg2[%c0_75, %c3_76, %c4_77] : memref<1x16x256xf32, #tpu.memory_space<vmem>>, vector<1x10x128xf32>
    %153 = vector.shape_cast %152 : vector<1x10x128xf32> to vector<10x128xf32>
    %154 = vector.broadcast %151 : f32 to vector<10x128xf32>
    %155 = arith.mulf %154, %153 : vector<10x128xf32>
    %156 = arith.addf %150, %155 : vector<10x128xf32>
    %c26 = arith.constant 26 : index
    %157 = memref.load %arg1[%c26] : memref<49xf32, #tpu.memory_space<smem>>
    %c0_78 = arith.constant 0 : index
    %c3_79 = arith.constant 3 : index
    %c5_80 = arith.constant 5 : index
    %158 = vector.load %arg2[%c0_78, %c3_79, %c5_80] : memref<1x16x256xf32, #tpu.memory_space<vmem>>, vector<1x10x128xf32>
    %159 = vector.shape_cast %158 : vector<1x10x128xf32> to vector<10x128xf32>
    %160 = vector.broadcast %157 : f32 to vector<10x128xf32>
    %161 = arith.mulf %160, %159 : vector<10x128xf32>
    %162 = arith.addf %156, %161 : vector<10x128xf32>
    %c27 = arith.constant 27 : index
    %163 = memref.load %arg1[%c27] : memref<49xf32, #tpu.memory_space<smem>>
    %c0_81 = arith.constant 0 : index
    %c3_82 = arith.constant 3 : index
    %c6_83 = arith.constant 6 : index
    %164 = vector.load %arg2[%c0_81, %c3_82, %c6_83] : memref<1x16x256xf32, #tpu.memory_space<vmem>>, vector<1x10x128xf32>
    %165 = vector.shape_cast %164 : vector<1x10x128xf32> to vector<10x128xf32>
    %166 = vector.broadcast %163 : f32 to vector<10x128xf32>
    %167 = arith.mulf %166, %165 : vector<10x128xf32>
    %168 = arith.addf %162, %167 : vector<10x128xf32>
    %c28 = arith.constant 28 : index
    %169 = memref.load %arg1[%c28] : memref<49xf32, #tpu.memory_space<smem>>
    %c0_84 = arith.constant 0 : index
    %c4_85 = arith.constant 4 : index
    %c0_86 = arith.constant 0 : index
    %170 = vector.load %arg2[%c0_84, %c4_85, %c0_86] : memref<1x16x256xf32, #tpu.memory_space<vmem>>, vector<1x10x128xf32>
    %171 = vector.shape_cast %170 : vector<1x10x128xf32> to vector<10x128xf32>
    %172 = vector.broadcast %169 : f32 to vector<10x128xf32>
    %173 = arith.mulf %172, %171 : vector<10x128xf32>
    %174 = arith.addf %168, %173 : vector<10x128xf32>
    %c29 = arith.constant 29 : index
    %175 = memref.load %arg1[%c29] : memref<49xf32, #tpu.memory_space<smem>>
    %c0_87 = arith.constant 0 : index
    %c4_88 = arith.constant 4 : index
    %c1_89 = arith.constant 1 : index
    %176 = vector.load %arg2[%c0_87, %c4_88, %c1_89] : memref<1x16x256xf32, #tpu.memory_space<vmem>>, vector<1x10x128xf32>
    %177 = vector.shape_cast %176 : vector<1x10x128xf32> to vector<10x128xf32>
    %178 = vector.broadcast %175 : f32 to vector<10x128xf32>
    %179 = arith.mulf %178, %177 : vector<10x128xf32>
    %180 = arith.addf %174, %179 : vector<10x128xf32>
    %c30 = arith.constant 30 : index
    %181 = memref.load %arg1[%c30] : memref<49xf32, #tpu.memory_space<smem>>
    %c0_90 = arith.constant 0 : index
    %c4_91 = arith.constant 4 : index
    %c2_92 = arith.constant 2 : index
    %182 = vector.load %arg2[%c0_90, %c4_91, %c2_92] : memref<1x16x256xf32, #tpu.memory_space<vmem>>, vector<1x10x128xf32>
    %183 = vector.shape_cast %182 : vector<1x10x128xf32> to vector<10x128xf32>
    %184 = vector.broadcast %181 : f32 to vector<10x128xf32>
    %185 = arith.mulf %184, %183 : vector<10x128xf32>
    %186 = arith.addf %180, %185 : vector<10x128xf32>
    %c31 = arith.constant 31 : index
    %187 = memref.load %arg1[%c31] : memref<49xf32, #tpu.memory_space<smem>>
    %c0_93 = arith.constant 0 : index
    %c4_94 = arith.constant 4 : index
    %c3_95 = arith.constant 3 : index
    %188 = vector.load %arg2[%c0_93, %c4_94, %c3_95] : memref<1x16x256xf32, #tpu.memory_space<vmem>>, vector<1x10x128xf32>
    %189 = vector.shape_cast %188 : vector<1x10x128xf32> to vector<10x128xf32>
    %190 = vector.broadcast %187 : f32 to vector<10x128xf32>
    %191 = arith.mulf %190, %189 : vector<10x128xf32>
    %192 = arith.addf %186, %191 : vector<10x128xf32>
    %c32 = arith.constant 32 : index
    %193 = memref.load %arg1[%c32] : memref<49xf32, #tpu.memory_space<smem>>
    %c0_96 = arith.constant 0 : index
    %c4_97 = arith.constant 4 : index
    %c4_98 = arith.constant 4 : index
    %194 = vector.load %arg2[%c0_96, %c4_97, %c4_98] : memref<1x16x256xf32, #tpu.memory_space<vmem>>, vector<1x10x128xf32>
    %195 = vector.shape_cast %194 : vector<1x10x128xf32> to vector<10x128xf32>
    %196 = vector.broadcast %193 : f32 to vector<10x128xf32>
    %197 = arith.mulf %196, %195 : vector<10x128xf32>
    %198 = arith.addf %192, %197 : vector<10x128xf32>
    %c33 = arith.constant 33 : index
    %199 = memref.load %arg1[%c33] : memref<49xf32, #tpu.memory_space<smem>>
    %c0_99 = arith.constant 0 : index
    %c4_100 = arith.constant 4 : index
    %c5_101 = arith.constant 5 : index
    %200 = vector.load %arg2[%c0_99, %c4_100, %c5_101] : memref<1x16x256xf32, #tpu.memory_space<vmem>>, vector<1x10x128xf32>
    %201 = vector.shape_cast %200 : vector<1x10x128xf32> to vector<10x128xf32>
    %202 = vector.broadcast %199 : f32 to vector<10x128xf32>
    %203 = arith.mulf %202, %201 : vector<10x128xf32>
    %204 = arith.addf %198, %203 : vector<10x128xf32>
    %c34 = arith.constant 34 : index
    %205 = memref.load %arg1[%c34] : memref<49xf32, #tpu.memory_space<smem>>
    %c0_102 = arith.constant 0 : index
    %c4_103 = arith.constant 4 : index
    %c6_104 = arith.constant 6 : index
    %206 = vector.load %arg2[%c0_102, %c4_103, %c6_104] : memref<1x16x256xf32, #tpu.memory_space<vmem>>, vector<1x10x128xf32>
    %207 = vector.shape_cast %206 : vector<1x10x128xf32> to vector<10x128xf32>
    %208 = vector.broadcast %205 : f32 to vector<10x128xf32>
    %209 = arith.mulf %208, %207 : vector<10x128xf32>
    %210 = arith.addf %204, %209 : vector<10x128xf32>
    %c35 = arith.constant 35 : index
    %211 = memref.load %arg1[%c35] : memref<49xf32, #tpu.memory_space<smem>>
    %c0_105 = arith.constant 0 : index
    %c5_106 = arith.constant 5 : index
    %c0_107 = arith.constant 0 : index
    %212 = vector.load %arg2[%c0_105, %c5_106, %c0_107] : memref<1x16x256xf32, #tpu.memory_space<vmem>>, vector<1x10x128xf32>
    %213 = vector.shape_cast %212 : vector<1x10x128xf32> to vector<10x128xf32>
    %214 = vector.broadcast %211 : f32 to vector<10x128xf32>
    %215 = arith.mulf %214, %213 : vector<10x128xf32>
    %216 = arith.addf %210, %215 : vector<10x128xf32>
    %c36 = arith.constant 36 : index
    %217 = memref.load %arg1[%c36] : memref<49xf32, #tpu.memory_space<smem>>
    %c0_108 = arith.constant 0 : index
    %c5_109 = arith.constant 5 : index
    %c1_110 = arith.constant 1 : index
    %218 = vector.load %arg2[%c0_108, %c5_109, %c1_110] : memref<1x16x256xf32, #tpu.memory_space<vmem>>, vector<1x10x128xf32>
    %219 = vector.shape_cast %218 : vector<1x10x128xf32> to vector<10x128xf32>
    %220 = vector.broadcast %217 : f32 to vector<10x128xf32>
    %221 = arith.mulf %220, %219 : vector<10x128xf32>
    %222 = arith.addf %216, %221 : vector<10x128xf32>
    %c37 = arith.constant 37 : index
    %223 = memref.load %arg1[%c37] : memref<49xf32, #tpu.memory_space<smem>>
    %c0_111 = arith.constant 0 : index
    %c5_112 = arith.constant 5 : index
    %c2_113 = arith.constant 2 : index
    %224 = vector.load %arg2[%c0_111, %c5_112, %c2_113] : memref<1x16x256xf32, #tpu.memory_space<vmem>>, vector<1x10x128xf32>
    %225 = vector.shape_cast %224 : vector<1x10x128xf32> to vector<10x128xf32>
    %226 = vector.broadcast %223 : f32 to vector<10x128xf32>
    %227 = arith.mulf %226, %225 : vector<10x128xf32>
    %228 = arith.addf %222, %227 : vector<10x128xf32>
    %c38 = arith.constant 38 : index
    %229 = memref.load %arg1[%c38] : memref<49xf32, #tpu.memory_space<smem>>
    %c0_114 = arith.constant 0 : index
    %c5_115 = arith.constant 5 : index
    %c3_116 = arith.constant 3 : index
    %230 = vector.load %arg2[%c0_114, %c5_115, %c3_116] : memref<1x16x256xf32, #tpu.memory_space<vmem>>, vector<1x10x128xf32>
    %231 = vector.shape_cast %230 : vector<1x10x128xf32> to vector<10x128xf32>
    %232 = vector.broadcast %229 : f32 to vector<10x128xf32>
    %233 = arith.mulf %232, %231 : vector<10x128xf32>
    %234 = arith.addf %228, %233 : vector<10x128xf32>
    %c39 = arith.constant 39 : index
    %235 = memref.load %arg1[%c39] : memref<49xf32, #tpu.memory_space<smem>>
    %c0_117 = arith.constant 0 : index
    %c5_118 = arith.constant 5 : index
    %c4_119 = arith.constant 4 : index
    %236 = vector.load %arg2[%c0_117, %c5_118, %c4_119] : memref<1x16x256xf32, #tpu.memory_space<vmem>>, vector<1x10x128xf32>
    %237 = vector.shape_cast %236 : vector<1x10x128xf32> to vector<10x128xf32>
    %238 = vector.broadcast %235 : f32 to vector<10x128xf32>
    %239 = arith.mulf %238, %237 : vector<10x128xf32>
    %240 = arith.addf %234, %239 : vector<10x128xf32>
    %c40 = arith.constant 40 : index
    %241 = memref.load %arg1[%c40] : memref<49xf32, #tpu.memory_space<smem>>
    %c0_120 = arith.constant 0 : index
    %c5_121 = arith.constant 5 : index
    %c5_122 = arith.constant 5 : index
    %242 = vector.load %arg2[%c0_120, %c5_121, %c5_122] : memref<1x16x256xf32, #tpu.memory_space<vmem>>, vector<1x10x128xf32>
    %243 = vector.shape_cast %242 : vector<1x10x128xf32> to vector<10x128xf32>
    %244 = vector.broadcast %241 : f32 to vector<10x128xf32>
    %245 = arith.mulf %244, %243 : vector<10x128xf32>
    %246 = arith.addf %240, %245 : vector<10x128xf32>
    %c41 = arith.constant 41 : index
    %247 = memref.load %arg1[%c41] : memref<49xf32, #tpu.memory_space<smem>>
    %c0_123 = arith.constant 0 : index
    %c5_124 = arith.constant 5 : index
    %c6_125 = arith.constant 6 : index
    %248 = vector.load %arg2[%c0_123, %c5_124, %c6_125] : memref<1x16x256xf32, #tpu.memory_space<vmem>>, vector<1x10x128xf32>
    %249 = vector.shape_cast %248 : vector<1x10x128xf32> to vector<10x128xf32>
    %250 = vector.broadcast %247 : f32 to vector<10x128xf32>
    %251 = arith.mulf %250, %249 : vector<10x128xf32>
    %252 = arith.addf %246, %251 : vector<10x128xf32>
    %c42 = arith.constant 42 : index
    %253 = memref.load %arg1[%c42] : memref<49xf32, #tpu.memory_space<smem>>
    %c0_126 = arith.constant 0 : index
    %c6_127 = arith.constant 6 : index
    %c0_128 = arith.constant 0 : index
    %254 = vector.load %arg2[%c0_126, %c6_127, %c0_128] : memref<1x16x256xf32, #tpu.memory_space<vmem>>, vector<1x10x128xf32>
    %255 = vector.shape_cast %254 : vector<1x10x128xf32> to vector<10x128xf32>
    %256 = vector.broadcast %253 : f32 to vector<10x128xf32>
    %257 = arith.mulf %256, %255 : vector<10x128xf32>
    %258 = arith.addf %252, %257 : vector<10x128xf32>
    %c43 = arith.constant 43 : index
    %259 = memref.load %arg1[%c43] : memref<49xf32, #tpu.memory_space<smem>>
    %c0_129 = arith.constant 0 : index
    %c6_130 = arith.constant 6 : index
    %c1_131 = arith.constant 1 : index
    %260 = vector.load %arg2[%c0_129, %c6_130, %c1_131] : memref<1x16x256xf32, #tpu.memory_space<vmem>>, vector<1x10x128xf32>
    %261 = vector.shape_cast %260 : vector<1x10x128xf32> to vector<10x128xf32>
    %262 = vector.broadcast %259 : f32 to vector<10x128xf32>
    %263 = arith.mulf %262, %261 : vector<10x128xf32>
    %264 = arith.addf %258, %263 : vector<10x128xf32>
    %c44 = arith.constant 44 : index
    %265 = memref.load %arg1[%c44] : memref<49xf32, #tpu.memory_space<smem>>
    %c0_132 = arith.constant 0 : index
    %c6_133 = arith.constant 6 : index
    %c2_134 = arith.constant 2 : index
    %266 = vector.load %arg2[%c0_132, %c6_133, %c2_134] : memref<1x16x256xf32, #tpu.memory_space<vmem>>, vector<1x10x128xf32>
    %267 = vector.shape_cast %266 : vector<1x10x128xf32> to vector<10x128xf32>
    %268 = vector.broadcast %265 : f32 to vector<10x128xf32>
    %269 = arith.mulf %268, %267 : vector<10x128xf32>
    %270 = arith.addf %264, %269 : vector<10x128xf32>
    %c45 = arith.constant 45 : index
    %271 = memref.load %arg1[%c45] : memref<49xf32, #tpu.memory_space<smem>>
    %c0_135 = arith.constant 0 : index
    %c6_136 = arith.constant 6 : index
    %c3_137 = arith.constant 3 : index
    %272 = vector.load %arg2[%c0_135, %c6_136, %c3_137] : memref<1x16x256xf32, #tpu.memory_space<vmem>>, vector<1x10x128xf32>
    %273 = vector.shape_cast %272 : vector<1x10x128xf32> to vector<10x128xf32>
    %274 = vector.broadcast %271 : f32 to vector<10x128xf32>
    %275 = arith.mulf %274, %273 : vector<10x128xf32>
    %276 = arith.addf %270, %275 : vector<10x128xf32>
    %c46 = arith.constant 46 : index
    %277 = memref.load %arg1[%c46] : memref<49xf32, #tpu.memory_space<smem>>
    %c0_138 = arith.constant 0 : index
    %c6_139 = arith.constant 6 : index
    %c4_140 = arith.constant 4 : index
    %278 = vector.load %arg2[%c0_138, %c6_139, %c4_140] : memref<1x16x256xf32, #tpu.memory_space<vmem>>, vector<1x10x128xf32>
    %279 = vector.shape_cast %278 : vector<1x10x128xf32> to vector<10x128xf32>
    %280 = vector.broadcast %277 : f32 to vector<10x128xf32>
    %281 = arith.mulf %280, %279 : vector<10x128xf32>
    %282 = arith.addf %276, %281 : vector<10x128xf32>
    %c47 = arith.constant 47 : index
    %283 = memref.load %arg1[%c47] : memref<49xf32, #tpu.memory_space<smem>>
    %c0_141 = arith.constant 0 : index
    %c6_142 = arith.constant 6 : index
    %c5_143 = arith.constant 5 : index
    %284 = vector.load %arg2[%c0_141, %c6_142, %c5_143] : memref<1x16x256xf32, #tpu.memory_space<vmem>>, vector<1x10x128xf32>
    %285 = vector.shape_cast %284 : vector<1x10x128xf32> to vector<10x128xf32>
    %286 = vector.broadcast %283 : f32 to vector<10x128xf32>
    %287 = arith.mulf %286, %285 : vector<10x128xf32>
    %288 = arith.addf %282, %287 : vector<10x128xf32>
    %c48 = arith.constant 48 : index
    %289 = memref.load %arg1[%c48] : memref<49xf32, #tpu.memory_space<smem>>
    %c0_144 = arith.constant 0 : index
    %c6_145 = arith.constant 6 : index
    %c6_146 = arith.constant 6 : index
    %290 = vector.load %arg2[%c0_144, %c6_145, %c6_146] : memref<1x16x256xf32, #tpu.memory_space<vmem>>, vector<1x10x128xf32>
    %291 = vector.shape_cast %290 : vector<1x10x128xf32> to vector<10x128xf32>
    %292 = vector.broadcast %289 : f32 to vector<10x128xf32>
    %293 = arith.mulf %292, %291 : vector<10x128xf32>
    %294 = arith.addf %288, %293 : vector<10x128xf32>
    %c0_147 = arith.constant 0 : index
    %c0_148 = arith.constant 0 : index
    %c0_149 = arith.constant 0 : index
    %c0_150 = arith.constant 0 : index
    %295 = vector.load %arg3[%c0_147, %c0_148, %c0_149, %c0_150] : memref<1x3x10x128xf32, #tpu.memory_space<vmem>>, vector<1x1x10x128xf32>
    %296 = vector.shape_cast %295 : vector<1x1x10x128xf32> to vector<10x128xf32>
    %297 = vector.shape_cast %294 : vector<10x128xf32> to vector<1x1x10x128xf32>
    tpu.vector_store %arg3[%c0_147, %c0_148, %c0_149, %c0_150], %297 {strides = array<i32>} : memref<1x3x10x128xf32, #tpu.memory_space<vmem>>, vector<1x1x10x128xf32>,
    %c0_151 = arith.constant 0 : index
    %c1_152 = arith.constant 1 : index
    %c0_153 = arith.constant 0 : index
    %c0_154 = arith.constant 0 : index
    %298 = vector.load %arg3[%c0_151, %c1_152, %c0_153, %c0_154] : memref<1x3x10x128xf32, #tpu.memory_space<vmem>>, vector<1x1x10x128xf32>
    %299 = vector.shape_cast %298 : vector<1x1x10x128xf32> to vector<10x128xf32>
    %300 = vector.shape_cast %294 : vector<10x128xf32> to vector<1x1x10x128xf32>
    tpu.vector_store %arg3[%c0_151, %c1_152, %c0_153, %c0_154], %300 {strides = array<i32>} : memref<1x3x10x128xf32, #tpu.memory_space<vmem>>, vector<1x1x10x128xf32>,
    %c0_155 = arith.constant 0 : index
    %c2_156 = arith.constant 2 : index
    %c0_157 = arith.constant 0 : index
    %c0_158 = arith.constant 0 : index
    %301 = vector.load %arg3[%c0_155, %c2_156, %c0_157, %c0_158] : memref<1x3x10x128xf32, #tpu.memory_space<vmem>>, vector<1x1x10x128xf32>
    %302 = vector.shape_cast %301 : vector<1x1x10x128xf32> to vector<10x128xf32>
    %303 = vector.shape_cast %294 : vector<10x128xf32> to vector<1x1x10x128xf32>
    tpu.vector_store %arg3[%c0_155, %c2_156, %c0_157, %c0_158], %303 {strides = array<i32>} : memref<1x3x10x128xf32, #tpu.memory_space<vmem>>, vector<1x1x10x128xf32>,
    return
  }
  func.func @transform_0(%arg0: i32) -> i32 {
    %c0_i32 = arith.constant 0 : i32
    %c0_i32_0 = arith.constant 0 : i32
    return %c0_i32 : i32
  }
  func.func @transform_1(%arg0: i32) -> (i32, i32, i32) {
    %c0_i32 = arith.constant 0 : i32
    %c0_i32_0 = arith.constant 0 : i32
    %c0_i32_1 = arith.constant 0 : i32
    return %arg0, %c0_i32, %c0_i32_0 : i32, i32, i32
  }
  func.func @transform_2(%arg0: i32) -> (i32, i32, i32, i32) {
    %c0_i32 = arith.constant 0 : i32
    %c0_i32_0 = arith.constant 0 : i32
    %c0_i32_1 = arith.constant 0 : i32
    %c0_i32_2 = arith.constant 0 : i32
    return %arg0, %c0_i32, %c0_i32_0, %c0_i32_1 : i32, i32, i32, i32
  }
}

</mosaic_0001>

<bundles_post_ra>
// kernel: squeeze.1
= control target key start
LH: loop header
LB: loop body
LE: loop exit
PB: predicated region body
PF: predicated region fallthrough
CT: control target
= control target key end

     0   :  { %s59_s10 = smov 42   ;;  %s60_s11 = smov 28   ;;  %vm3_vm0 = vcmask 56320   ;;  %vm9_vm1 = vcmask 400720   ;;  %vm15_vm2 = vcmask 343320   ;;  %vm21_vm3 = vcmask 285920   ;;  %s99_s0 = inlined_call_operand.vmem [shape: f32[1,1,7,7], index: 0, kind: input, shape index: {}]   ;;  %s100_s1 = inlined_call_operand.vmem [shape: f32[49], index: 1, kind: output, shape index: {}]  }
   0x1   :  { %v47_v0 = vld [vmem:[%s99_s0 + $0x6] sm:$0x1]   ;;  %v49_v1 = vld [vmem:[%s99_s0 + $0x4] sm:$0x1]   ;;  %v48_v2 = vld [vmem:[%s99_s0 + $0x5] sm:$0x1]  }
   0x2   :  { %7 = vrot.lane.b32.xlu0 %v47_v0, %s59_s10  ;;  %19 = vrot.lane.b32.xlu1 %v49_v1, %s60_s11  ;;  %v50_v3 = vld [vmem:[%s99_s0 + $0x3] sm:$0x1]   ;;  %v2_v4 = vld [vmem:[%s99_s0] sm:$0x1]   ;;  %s61_s18 = smov 35   ;;  %s62_s19 = smov 21  }
   0x3   :  { %4 = vst.msk [vmem:[#allocation0] sm:$0x1] %vm3_vm0, %v2_v4   ;;  %v51_v5 = vld [vmem:[%s99_s0 + $0x2] sm:$0x1]   ;;  %v52_v6 = vld [vmem:[%s99_s0 + $0x1] sm:$0x1]  }
   0x4   :  { %s63_s0 = smov 14   ;;  %s64_s24 = smov 7   ;;  %vm27_vm4 = vcmask 228520   ;;  %vm33_vm5 = vcmask 171120   ;;  %vm39_vm6 = vcmask 113720  }
   0x6   :  { %13 = vrot.lane.b32.xlu0 %v48_v2, %s61_s18  ;;  %25 = vrot.lane.b32.xlu1 %v50_v3, %s62_s19 }
   0xa   :  { %31 = vrot.lane.b32.xlu0 %v51_v5, %s63_s0  ;;  %37 = vrot.lane.b32.xlu1 %v52_v6, %s64_s24 }
  0x74   :  { %v8_v7 = vpop.permute.xlu0 %7   ;;  %v20_v8 = vpop.permute.xlu1 %19  }
  0x75   :  { %10 = vst.msk [vmem:[#allocation0] sm:$0x1] %vm9_vm1, %v8_v7  }
  0x78   :  { %v14_v9 = vpop.permute.xlu0 %13   ;;  %v26_v10 = vpop.permute.xlu1 %25  }
  0x79   :  { %16 = vst.msk [vmem:[#allocation0] sm:$0x1] %vm15_vm2, %v14_v9  }
  0x7a   :  { %22 = vst.msk [vmem:[#allocation0] sm:$0x1] %vm21_vm3, %v20_v8  }
  0x7b   :  { %28 = vst.msk [vmem:[#allocation0] sm:$0x1] %vm27_vm4, %v26_v10  }
  0x7c   :  { %v32_v11 = vpop.permute.xlu0 %31   ;;  %v38_v12 = vpop.permute.xlu1 %37  }
  0x7d   :  { %34 = vst.msk [vmem:[#allocation0] sm:$0x1] %vm33_vm5, %v32_v11  }
  0x7e   :  { %40 = vst.msk [vmem:[#allocation0] sm:$0x1] %vm39_vm6, %v38_v12  }
  0x85   :  { %v44_v13 = vld [vmem:[#allocation0] sm:$0x1] }
  0x86   :  { %46 = vst [vmem:[%s100_s1] sm:$0x1] %v44_v13 }

// kernel: _gabor_forward.1
= control target key start
LH: loop header
LB: loop body
LE: loop exit
PB: predicated region body
PF: predicated region fallthrough
CT: control target
= control target key end

     0   :  { %7 = vsyncpa [#allocation3], 0  ;;  %s2387_s0 = inlined_call_operand.vmem [shape: f32[49], index: 0, kind: input, shape index: {}]   ;;  %s2388_s1 = inlined_call_operand.vmem [shape: f32[1,16,256], index: 1, kind: input, shape index: {}]   ;;  %s2389_s2 = inlined_call_operand.vmem [shape: f32[1,3,10,128], index: 2, kind: output, shape index: {}]  }
   0x1   :  { %s14_s11 = sshll.u32 %s2387_s0, 4  ;;  %s15_s11 = int_to_ptr.vmem [resolvable:$true] %s14_s11 }
   0x2   :  { %s1458_s12 = scalar_lea.vmem %s15_s11, 16  ;;  %p1463_p1 = scmp.lt.s32.totalorder %s15_s11, %s15_s11 }
   0x3   :  { %p1459_p0 = scmp.ne.s32.totalorder %s15_s11, %s1458_s12  ;;  %p1464_p2 = scmp.lt.s32.totalorder %s1458_s12, %s1458_s12 }
   0x5   :  { %p1465_p3 = por %p1464_p2, %p1463_p1 }
   0x7   :  { %p1466_p4 = pnand %p1465_p3, %p1459_p0 }
   0x9   :  { %1469 = shalt.err (!%p1466_p4)
}
   0xa   :  { %s1472_s13 = smov [#allocation2]  }
   0xb   :  { %17 = dma.vmem_to_smem %s15_s11, 16, %s1472_s13, [#allocation3]  }
   0xc   :  { %1470 = dma.done.wait [#allocation3], 16  }
   0xd   :  { %1471 = vsyncadd [#allocation3], 4294967280 }
   0xe   :  { %23 = sfence }
   0xf   :  { %s1399_s14 = sld [smem:[#allocation2 + $0x1]]  ;;  %s1400_s15 = sld [smem:[#allocation2 + $0x2]]  ;;  %v1500_v0 = vld [vmem:[%s2388_s1 + $0x10] sm:$0x3]  ;;  %v1505_v1 = vld [vmem:[%s2388_s1] sm:$0xff]  ;;  %v34_v4 = vld [vmem:[%s2388_s1 + $0x8] sm:$0xff] }
  0x10   :  { %v1510_v3 = vld [vmem:[%s2388_s1 + $0x18] sm:$0x3]  ;;  %s1473_s23 = smov 127   ;;  %s1401_s24 = sld [smem:[#allocation2 + $0x3]]  ;;  %v1551_v30 = vld [vmem:[%s2388_s1 + $0x8] sm:$0xfe] }
  0x11   :  { %s1474_s25 = smov 126   ;;  %s1402_s26 = sld [smem:[#allocation2 + $0x4]]  ;;  %v1556_v31 = vld [vmem:[%s2388_s1 + $0x18] sm:$0x7]  ;;  %v1561_v33 = vld [vmem:[%s2388_s1] sm:$0xfe] }
  0x12   :  { %s1475_s27 = smov 125   ;;  %s1403_s28 = sld [smem:[#allocation2 + $0x5]]  ;;  %v1566_v34 = vld [vmem:[%s2388_s1 + $0x10] sm:$0x7]  ;;  %vm194_vm0 = vcmask 1046528   ;;  %vm394_vm1 = vcmask 1045504  }
  0x13   :  { %s1476_s29 = smov 124   ;;  %s1404_s30 = sld [smem:[#allocation2 + $0x6]]  ;;  %vm594_vm2 = vcmask 1044480   ;;  %vm54_vm3 = vcmask 1039360   ;;  %vm79_vm4 = vcmask 1031168   ;;  %vm104_vm5 = vcmask 1022976  }
  0x14   :  { %s1406_s3 = sld [smem:[#allocation2 + $0x8]]  ;;  %s1477_s4 = smov 123   ;;  %vm129_vm6 = vcmask 1014784   ;;  %vm154_vm7 = vcmask 1006592   ;;  %vm179_vm8 = vcmask 998400   ;;  %vm794_vm9 = vcmask 1043456  }
  0x15   :  { %v37_v2 = vstv %s1399_s14  ;;  %v62_v9 = vstv %s1400_s15  ;;  %s1407_s5 = sld [smem:[#allocation2 + $0x9]]  ;;  %s1478_s14 = smov 122   ;;  %vm994_vm10 = vcmask 1042432   ;;  %vm1194_vm11 = vcmask 1041408  }
  0x16   :  { %v40_v5 = vmul.f32 %v37_v2, %v1500_v0  ;;  %v38_v6 = vmul.f32 %v37_v2, %v1505_v1  ;;  %v41_v7 = vmul.f32 %v37_v2, %v1510_v3  ;;  %v39_v8 = vmul.f32 %v37_v2, %v34_v4  ;;  %s1408_s15 = sld [smem:[#allocation2 + $0xa]]  ;;  %s1409_s16 = sld [smem:[#allocation2 + $0xb]] }
  0x17   :  { %v64_v10 = vmul.f32 %v62_v9, %v34_v4  ;;  %v63_v11 = vmul.f32 %v62_v9, %v1505_v1  ;;  %v66_v12 = vmul.f32 %v62_v9, %v1510_v3  ;;  %v65_v13 = vmul.f32 %v62_v9, %v1500_v0  ;;  %s1410_s17 = sld [smem:[#allocation2 + $0xc]]  ;;  %s1411_s0 = sld [smem:[#allocation2 + $0xd]] }
  0x18   :  { %50 = vrot.lane.b32.xlu1 %v40_v5, %s1473_s23  ;;  %46 = vrot.lane.b32.xlu0 %v38_v6, %s1473_s23  ;;  %v87_v14 = vstv %s1401_s24  ;;  %v112_v19 = vstv %s1402_s26  ;;  %s1413_s18 = sld [smem:[#allocation2 + $0xf]]  ;;  %s1414_s21 = sld [smem:[#allocation2 + $0x10]] }
  0x19   :  { %v89_v15 = vmul.f32 %v87_v14, %v34_v4  ;;  %v88_v16 = vmul.f32 %v87_v14, %v1505_v1  ;;  %v91_v17 = vmul.f32 %v87_v14, %v1510_v3  ;;  %v90_v18 = vmul.f32 %v87_v14, %v1500_v0  ;;  %s1416_s6 = sld [smem:[#allocation2 + $0x12]]  ;;  %s1417_s7 = sld [smem:[#allocation2 + $0x13]] }
  0x1a   :  { %v114_v20 = vmul.f32 %v112_v19, %v34_v4  ;;  %v113_v21 = vmul.f32 %v112_v19, %v1505_v1  ;;  %v116_v22 = vmul.f32 %v112_v19, %v1510_v3  ;;  %v115_v23 = vmul.f32 %v112_v19, %v1500_v0  ;;  %s1418_s8 = sld [smem:[#allocation2 + $0x14]]  ;;  %s1420_s9 = sld [smem:[#allocation2 + $0x16]] }
  0x1b   :  { %v137_v24 = vstv %s1403_s28  ;;  %v162_v29 = vstv %s1404_s30  ;;  %v207_v32 = vstv %s1406_s3  ;;  %v237_v43 = vstv %s1407_s5  ;;  %s1415_s5 = sld [smem:[#allocation2 + $0x11]]  ;;  %s1421_s12 = sld [smem:[#allocation2 + $0x17]] }
  0x1c   :  { %52 = vrot.lane.b32.xlu1 %v41_v7, %s1473_s23  ;;  %48 = vrot.lane.b32.xlu0 %v39_v8, %s1473_s23  ;;  %v139_v25 = vmul.f32 %v137_v24, %v34_v4  ;;  %v138_v26 = vmul.f32 %v137_v24, %v1505_v1  ;;  %v141_v27 = vmul.f32 %v137_v24, %v1510_v3  ;;  %v267_v58 = vstv %s1408_s15  ;;  %s1745_s19 = sld [smem:[#allocation2]]  ;;  %s1761_s20 = sld [smem:[#allocation2 + $0x7]] }
  0x1d   :  { %v140_v28 = vmul.f32 %v137_v24, %v1500_v0  ;;  %v164_v35 = vmul.f32 %v162_v29, %v34_v4  ;;  %v163_v36 = vmul.f32 %v162_v29, %v1505_v1  ;;  %v209_v37 = vmul.f32 %v207_v32, %v1551_v30  ;;  %s1796_s30 = sld [smem:[#allocation2 + $0x19]]  ;;  %s1424_s3 = sld [smem:[#allocation2 + $0x1a]] }
  0x1e   :  { %v211_v38 = vmul.f32 %v207_v32, %v1556_v31  ;;  %v208_v39 = vmul.f32 %v207_v32, %v1561_v33  ;;  %v210_v40 = vmul.f32 %v207_v32, %v1566_v34  ;;  %v166_v41 = vmul.f32 %v162_v29, %v1510_v3  ;;  %s1430_s24 = sld [smem:[#allocation2 + $0x20]]  ;;  %s1431_s26 = sld [smem:[#allocation2 + $0x21]] }
  0x1f   :  { %v165_v42 = vmul.f32 %v162_v29, %v1500_v0  ;;  %v219_v44 = vrot.slane %v209_v37, 1  ;;  %v239_v48 = vmul.f32 %v237_v43, %v1551_v30  ;;  %v241_v49 = vmul.f32 %v237_v43, %v1556_v31  ;;  %s2086_s15 = sld [smem:[#allocation2 + $0x26]]  ;;  %s2172_s22 = sld [smem:[#allocation2 + $0x28]] }
  0x20   :  { %73 = vrot.lane.b32.xlu1 %v64_v10, %s1474_s25  ;;  %71 = vrot.lane.b32.xlu0 %v63_v11, %s1474_s25  ;;  %v220_v45 = vrot.slane %v211_v38, 1  ;;  %v216_v46 = vrot.slane %v208_v39, 1  ;;  %v217_v47 = vrot.slane %v210_v40, 1  ;;  %v238_v52 = vmul.f32 %v237_v43, %v1561_v33  ;;  %v1632_v39 = vld [vmem:[%s2388_s1 + $0x8] sm:$0xfc]  ;;  %s1443_s10 = sld [smem:[#allocation2 + $0x2d]] }
  0x21   :  { %v240_v53 = vmul.f32 %v237_v43, %v1566_v34  ;;  %v249_v54 = vrot.slane %v239_v48, 1  ;;  %v250_v55 = vrot.slane %v241_v49, 1  ;;  %v269_v60 = vmul.f32 %v267_v58, %v1551_v30  ;;  %v1647_v43 = vld [vmem:[%s2388_s1 + $0x10] sm:$0xf]  ;;  %s2252_s11 = sld [smem:[#allocation2 + $0x1c]] }
  0x22   :  { %v221_v50 = vsel %vm194_vm0, %v219_v44, %v220_v45  ;;  %v218_v51 = vsel %vm194_vm0, %v216_v46, %v217_v47  ;;  %v246_v56 = vrot.slane %v238_v52, 1  ;;  %v271_v62 = vmul.f32 %v267_v58, %v1556_v31 }
  0x23   :  { %v247_v57 = vrot.slane %v240_v53, 1  ;;  %v251_v59 = vsel %vm194_vm0, %v249_v54, %v250_v55  ;;  %v268_v63 = vmul.f32 %v267_v58, %v1561_v33  ;;  %v270_v0 = vmul.f32 %v267_v58, %v1566_v34 }
  0x24   :  { %77 = vrot.lane.b32.xlu1 %v66_v12, %s1474_s25  ;;  %75 = vrot.lane.b32.xlu0 %v65_v13, %s1474_s25  ;;  %v297_v2 = vstv %s1409_s16  ;;  %v279_v3 = vrot.slane %v269_v60, 1  ;;  %v280_v4 = vrot.slane %v271_v62, 1  ;;  %v327_v13 = vstv %s1410_s17  ;;  %s1913_s17 = sld [smem:[#allocation2 + $0xe]]  ;;  %s2093_s16 = sld [smem:[#allocation2 + $0x15]] }
  0x25   :  { %v248_v61 = vsel %vm194_vm0, %v246_v56, %v247_v57  ;;  %v276_v5 = vrot.slane %v268_v63, 1  ;;  %v277_v6 = vrot.slane %v270_v0, 1  ;;  %v299_v7 = vmul.f32 %v297_v2, %v1551_v30 }
  0x26   :  { %v301_v8 = vmul.f32 %v297_v2, %v1556_v31  ;;  %v281_v9 = vsel %vm194_vm0, %v279_v3, %v280_v4  ;;  %v298_v11 = vmul.f32 %v297_v2, %v1561_v33  ;;  %v300_v12 = vmul.f32 %v297_v2, %v1566_v34 }
  0x27   :  { %v278_v10 = vsel %vm194_vm0, %v276_v5, %v277_v6  ;;  %v309_v14 = vrot.slane %v299_v7, 1  ;;  %v331_v19 = vmul.f32 %v327_v13, %v1556_v31  ;;  %v467_v2 = vstv %s1415_s5  ;;  %s1425_s5 = sld [smem:[#allocation2 + $0x1b]] }
  0x28   :  { %98 = vrot.lane.b32.xlu1 %v89_v15, %s1475_s27  ;;  %96 = vrot.lane.b32.xlu0 %v88_v16, %s1475_s27  ;;  %v310_v15 = vrot.slane %v301_v8, 1  ;;  %v306_v16 = vrot.slane %v298_v11, 1  ;;  %v470_v8 = vmul.f32 %v467_v2, %v1647_v43 }
  0x2c   :  { %102 = vrot.lane.b32.xlu1 %v91_v17, %s1475_s27  ;;  %100 = vrot.lane.b32.xlu0 %v90_v18, %s1475_s27  ;;  %v307_v17 = vrot.slane %v300_v12, 1  ;;  %v329_v18 = vmul.f32 %v327_v13, %v1551_v30 }
  0x2e   :  { %v339_v24 = vrot.slane %v329_v18, 1 }
  0x30   :  { %123 = vrot.lane.b32.xlu1 %v114_v20, %s1476_s29  ;;  %121 = vrot.lane.b32.xlu0 %v113_v21, %s1476_s29  ;;  %v311_v20 = vsel %vm194_vm0, %v309_v14, %v310_v15  ;;  %v308_v21 = vsel %vm194_vm0, %v306_v16, %v307_v17 }
  0x34   :  { %127 = vrot.lane.b32.xlu1 %v116_v22, %s1476_s29  ;;  %125 = vrot.lane.b32.xlu0 %v115_v23, %s1476_s29  ;;  %v328_v22 = vmul.f32 %v327_v13, %v1561_v33  ;;  %v330_v23 = vmul.f32 %v327_v13, %v1566_v34  ;;  %v477_v13 = vrot.slane %v470_v8, 2 }
  0x38   :  { %148 = vrot.lane.b32.xlu1 %v139_v25, %s1477_s4  ;;  %146 = vrot.lane.b32.xlu0 %v138_v26, %s1477_s4  ;;  %v340_v25 = vrot.slane %v331_v19, 1  ;;  %v336_v26 = vrot.slane %v328_v22, 1 }
  0x3c   :  { %152 = vrot.lane.b32.xlu1 %v141_v27, %s1477_s4  ;;  %150 = vrot.lane.b32.xlu0 %v140_v28, %s1477_s4  ;;  %v337_v27 = vrot.slane %v330_v23, 1  ;;  %v357_v28 = vstv %s1411_s0  ;;  %s1429_s0 = sld [smem:[#allocation2 + $0x1f]] }
  0x3d   :  { %v359_v29 = vmul.f32 %v357_v28, %v1551_v30  ;;  %v361_v32 = vmul.f32 %v357_v28, %v1556_v31  ;;  %v358_v37 = vmul.f32 %v357_v28, %v1561_v33  ;;  %v360_v38 = vmul.f32 %v357_v28, %v1566_v34  ;;  %v1637_v33 = vld [vmem:[%s2388_s1 + $0x18] sm:$0xf]  ;;  %v1642_v34 = vld [vmem:[%s2388_s1] sm:$0xfc] }
  0x3e   :  { %v407_v30 = vstv %s1413_s18  ;;  %v468_v7 = vmul.f32 %v467_v2, %v1642_v34 }
  0x3f   :  { %v369_v31 = vrot.slane %v359_v29, 1  ;;  %v370_v40 = vrot.slane %v361_v32, 1  ;;  %v409_v44 = vmul.f32 %v407_v30, %v1632_v39  ;;  %v408_v48 = vmul.f32 %v407_v30, %v1642_v34 }
  0x40   :  { %173 = vrot.lane.b32.xlu1 %v164_v35, %s1478_s14  ;;  %171 = vrot.lane.b32.xlu0 %v163_v36, %s1478_s14  ;;  %v341_v35 = vsel %vm194_vm0, %v339_v24, %v340_v25  ;;  %v338_v36 = vsel %vm194_vm0, %v336_v26, %v337_v27  ;;  %v410_v49 = vmul.f32 %v407_v30, %v1647_v43  ;;  %v476_v12 = vrot.slane %v468_v7, 2 }
  0x41   :  { %v371_v46 = vsel %vm194_vm0, %v369_v31, %v370_v40  ;;  %v416_v53 = vrot.slane %v408_v48, 2  ;;  %v527_v24 = vstv %s1417_s7  ;;  %s1428_s7 = sld [smem:[#allocation2 + $0x1e]] }
  0x42   :  { %v417_v54 = vrot.slane %v410_v49, 2  ;;  %v531_v28 = vmul.f32 %v527_v24, %v1637_v33 }
  0x44   :  { %177 = vrot.lane.b32.xlu1 %v166_v41, %s1478_s14  ;;  %175 = vrot.lane.b32.xlu0 %v165_v42, %s1478_s14  ;;  %v366_v41 = vrot.slane %v358_v37, 1  ;;  %v367_v42 = vrot.slane %v360_v38, 1  ;;  %v418_v58 = vsel %vm394_vm1, %v416_v53, %v417_v54 }
  0x48   :  { %224 = vrot.lane.b32.xlu1 %v221_v50, %s1473_s23  ;;  %222 = vrot.lane.b32.xlu0 %v218_v51, %s1473_s23  ;;  %v437_v50 = vstv %s1414_s21  ;;  %v419_v51 = vrot.slane %v409_v44, 2  ;;  %s1763_s21 = sld [smem:[#allocation2 + $0x18]] }
  0x49   :  { %v441_v56 = vmul.f32 %v437_v50, %v1637_v33  ;;  %v440_v60 = vmul.f32 %v437_v50, %v1647_v43 }
  0x4b   :  { %v450_v62 = vrot.slane %v441_v56, 2  ;;  %v447_v0 = vrot.slane %v440_v60, 2  ;;  %v1743_v60 = vld [vmem:[%s2388_s1 + $0x10] sm:$0x1f] }
  0x4c   :  { %228 = vrot.lane.b32.xlu1 %v220_v45, %s1473_s23  ;;  %226 = vrot.lane.b32.xlu0 %v217_v47, %s1473_s23  ;;  %v411_v45 = vmul.f32 %v407_v30, %v1637_v33  ;;  %v368_v47 = vsel %vm194_vm0, %v366_v41, %v367_v42  ;;  %v557_v30 = vstv %s1418_s8 }
  0x4e   :  { %v420_v52 = vrot.slane %v411_v45, 2 }
  0x50   :  { %254 = vrot.lane.b32.xlu1 %v251_v59, %s1474_s25  ;;  %252 = vrot.lane.b32.xlu0 %v248_v61, %s1474_s25  ;;  %v438_v59 = vmul.f32 %v437_v50, %v1642_v34 }
  0x52   :  { %v446_v63 = vrot.slane %v438_v59, 2  ;;  %v1738_v59 = vld [vmem:[%s2388_s1] sm:$0xf8] }
  0x54   :  { %258 = vrot.lane.b32.xlu1 %v250_v55, %s1474_s25  ;;  %256 = vrot.lane.b32.xlu0 %v247_v57, %s1474_s25  ;;  %v439_v55 = vmul.f32 %v437_v50, %v1632_v39  ;;  %v421_v57 = vsel %vm394_vm1, %v419_v51, %v420_v52  ;;  %v448_v5 = vsel %vm394_vm1, %v446_v63, %v447_v0 }
  0x55   :  { %v558_v50 = vmul.f32 %v557_v30, %v1642_v34  ;;  %v560_v51 = vmul.f32 %v557_v30, %v1647_v43 }
  0x56   :  { %v449_v61 = vrot.slane %v439_v55, 2 }
  0x57   :  { %v567_v56 = vrot.slane %v560_v51, 2 }
  0x58   :  { %284 = vrot.lane.b32.xlu1 %v281_v9, %s1475_s27  ;;  %282 = vrot.lane.b32.xlu0 %v278_v10, %s1475_s27  ;;  %v451_v3 = vsel %vm394_vm1, %v449_v61, %v450_v62  ;;  %v497_v9 = vstv %s1416_s6  ;;  %s1427_s6 = sld [smem:[#allocation2 + $0x1d]] }
  0x59   :  { %v499_v14 = vmul.f32 %v497_v9, %v1632_v39  ;;  %v498_v18 = vmul.f32 %v497_v9, %v1642_v34  ;;  %v500_v19 = vmul.f32 %v497_v9, %v1647_v43 }
  0x5b   :  { %v506_v22 = vrot.slane %v498_v18, 2  ;;  %v507_v23 = vrot.slane %v500_v19, 2 }
  0x5c   :  { %288 = vrot.lane.b32.xlu1 %v280_v4, %s1475_s27  ;;  %286 = vrot.lane.b32.xlu0 %v277_v6, %s1475_s27  ;;  %v469_v4 = vmul.f32 %v467_v2, %v1632_v39  ;;  %v471_v6 = vmul.f32 %v467_v2, %v1637_v33 }
  0x5d   :  { %v508_v32 = vsel %vm394_vm1, %v506_v22, %v507_v23 }
  0x5e   :  { %v479_v10 = vrot.slane %v469_v4, 2  ;;  %v480_v11 = vrot.slane %v471_v6, 2  ;;  %v637_v6 = vstv %s1421_s12  ;;  %s1444_s12 = sld [smem:[#allocation2 + $0x2e]] }
  0x60   :  { %314 = vrot.lane.b32.xlu1 %v311_v20, %s1476_s29  ;;  %312 = vrot.lane.b32.xlu0 %v308_v21, %s1476_s29  ;;  %v481_v16 = vsel %vm394_vm1, %v479_v10, %v480_v11  ;;  %v509_v20 = vrot.slane %v499_v14, 2 }
  0x64   :  { %318 = vrot.lane.b32.xlu1 %v310_v15, %s1476_s29  ;;  %316 = vrot.lane.b32.xlu0 %v307_v17, %s1476_s29  ;;  %v501_v15 = vmul.f32 %v497_v9, %v1637_v33  ;;  %v478_v17 = vsel %vm394_vm1, %v476_v12, %v477_v13 }
  0x66   :  { %v510_v21 = vrot.slane %v501_v15, 2 }
  0x68   :  { %344 = vrot.lane.b32.xlu1 %v341_v35, %s1477_s4  ;;  %342 = vrot.lane.b32.xlu0 %v338_v36, %s1477_s4  ;;  %v511_v29 = vsel %vm394_vm1, %v509_v20, %v510_v21  ;;  %v528_v35 = vmul.f32 %v527_v24, %v1642_v34  ;;  %v530_v36 = vmul.f32 %v527_v24, %v1647_v43  ;;  %v566_v34 = vrot.slane %v558_v50, 2  ;;  %v1733_v43 = vld [vmem:[%s2388_s1 + $0x18] sm:$0x1f] }
  0x69   :  { %v1768_v15 = vmul.f32 %v637_v6, %v1733_v43 }
  0x6a   :  { %v536_v41 = vrot.slane %v528_v35, 2  ;;  %v189_v35 = vstv %s1761_s20 }
  0x6c   :  { %348 = vrot.lane.b32.xlu1 %v340_v25, %s1477_s4  ;;  %346 = vrot.lane.b32.xlu0 %v337_v27, %s1477_s4  ;;  %v529_v27 = vmul.f32 %v527_v24, %v1632_v39 }
  0x6e   :  { %v539_v31 = vrot.slane %v529_v27, 2  ;;  %v650_v27 = vrot.slane %v1768_v15, 3 }
  0x70   :  { %374 = vrot.lane.b32.xlu1 %v371_v46, %s1478_s14  ;;  %372 = vrot.lane.b32.xlu0 %v368_v47, %s1478_s14  ;;  %v559_v46 = vmul.f32 %v557_v30, %v1632_v39  ;;  %v561_v47 = vmul.f32 %v557_v30, %v1637_v33  ;;  %v1728_v39 = vld [vmem:[%s2388_s1 + $0x8] sm:$0xf8]  ;;  %v607_v33 = vstv %s1420_s9  ;;  %s1442_s9 = sld [smem:[#allocation2 + $0x2c]] }
  0x71   :  { %v609_v61 = vmul.f32 %v607_v33, %v1728_v39  ;;  %v608_v2 = vmul.f32 %v607_v33, %v1738_v59  ;;  %v639_v14 = vmul.f32 %v637_v6, %v1728_v39 }
  0x72   :  { %v570_v55 = vrot.slane %v561_v47, 2 }
  0x73   :  { %v619_v7 = vrot.slane %v609_v61, 3  ;;  %v616_v9 = vrot.slane %v608_v2, 3  ;;  %v649_v24 = vrot.slane %v639_v14, 3  ;;  %v697_v61 = vstv %s1796_s30 }
  0x74   :  { %378 = vrot.lane.b32.xlu1 %v370_v40, %s1478_s14  ;;  %376 = vrot.lane.b32.xlu0 %v367_v42, %s1478_s14  ;;  %v540_v40 = vrot.slane %v531_v28, 2  ;;  %v537_v42 = vrot.slane %v530_v36, 2  ;;  %v187_v28 = vld [vmem:[%s2388_s1] sm:$0xfe]  ;;  %v667_v36 = vstv %s1763_s21 }
  0x75   :  { %v668_v50 = vmul.f32 %v667_v36, %v1738_v59  ;;  %v670_v51 = vmul.f32 %v667_v36, %v1743_v60 }
  0x76   :  { %v541_v48 = vsel %vm394_vm1, %v539_v31, %v540_v40  ;;  %v538_v49 = vsel %vm394_vm1, %v536_v41, %v537_v42  ;;  %v651_v41 = vsel %vm594_vm2, %v649_v24, %v650_v27 }
  0x77   :  { %v677_v2 = vrot.slane %v670_v51, 3 }
  0x78   :  { %424 = vrot.lane.b32.xlu1 %v421_v57, %s1473_s23  ;;  %422 = vrot.lane.b32.xlu0 %v418_v58, %s1473_s23 }
  0x7c   :  { %428 = vrot.lane.b32.xlu1 %v420_v52, %s1473_s23  ;;  %426 = vrot.lane.b32.xlu0 %v417_v54, %s1473_s23  ;;  %v569_v54 = vrot.slane %v559_v46, 2 }
  0x7e   :  { %v571_v63 = vsel %vm394_vm1, %v569_v54, %v570_v55 }
  0x80   :  { %454 = vrot.lane.b32.xlu1 %v451_v3, %s1474_s25  ;;  %452 = vrot.lane.b32.xlu0 %v448_v5, %s1474_s25  ;;  %v610_v3 = vmul.f32 %v607_v33, %v1743_v60 }
  0x82   :  { %v617_v10 = vrot.slane %v610_v3, 3 }
  0x84   :  { %458 = vrot.lane.b32.xlu1 %v450_v62, %s1474_s25  ;;  %456 = vrot.lane.b32.xlu0 %v447_v0, %s1474_s25  ;;  %v611_v62 = vmul.f32 %v607_v33, %v1733_v43  ;;  %v568_v0 = vsel %vm394_vm1, %v566_v34, %v567_v56  ;;  %v618_v19 = vsel %vm594_vm2, %v616_v9, %v617_v10 }
  0x86   :  { %v620_v8 = vrot.slane %v611_v62, 3 }
  0x88   :  { %484 = vrot.lane.b32.xlu1 %v481_v16, %s1475_s27  ;;  %482 = vrot.lane.b32.xlu0 %v478_v17, %s1475_s27  ;;  %v638_v16 = vmul.f32 %v637_v6, %v1738_v59  ;;  %v640_v17 = vmul.f32 %v637_v6, %v1743_v60  ;;  %v621_v18 = vsel %vm594_vm2, %v619_v7, %v620_v8 }
  0x8a   :  { %v1689_v25 = vpop.permute.xlu1 %50  ;;  %v1691_v26 = vpop.permute.xlu0 %46 }
  0x8c   :  { %488 = vrot.lane.b32.xlu1 %v480_v11, %s1475_s27  ;;  %486 = vrot.lane.b32.xlu0 %v477_v13, %s1475_s27  ;;  %v27_v13 = vstv %s1745_s19  ;;  %s1434_s19 = sld [smem:[#allocation2 + $0x24]] }
  0x8d   :  { %v28_v20 = vmul.f32 %v1505_v1, %v27_v13  ;;  %v188_v1 = vld [vmem:[%s2388_s1 + $0x10] sm:$0x7] }
  0x8e   :  { %v1701_v37 = vpop.permute.xlu1 %52  ;;  %v1703_v38 = vpop.permute.xlu0 %48  ;;  %v1804_v46 = vmul.f32 %v189_v35, %v188_v1  ;;  %v727_v1 = vstv %s1424_s3  ;;  %s1432_s3 = sld [smem:[#allocation2 + $0x22]] }
  0x90   :  { %514 = vrot.lane.b32.xlu1 %v511_v29, %s1476_s29  ;;  %512 = vrot.lane.b32.xlu0 %v508_v32, %s1476_s29  ;;  %v646_v29 = vrot.slane %v638_v16, 3  ;;  %v647_v32 = vrot.slane %v640_v17, 3  ;;  %v698_v16 = vmul.f32 %v697_v61, %v1738_v59  ;;  %v700_v17 = vmul.f32 %v697_v61, %v1743_v60 }
  0x92   :  { %v1707_v44 = vpop.permute.xlu1 %73  ;;  %v1709_v45 = vpop.permute.xlu0 %71 }
  0x94   :  { %518 = vrot.lane.b32.xlu1 %v510_v21, %s1476_s29  ;;  %516 = vrot.lane.b32.xlu0 %v507_v23, %s1476_s29  ;;  %v55_v23 = vsel %vm54_vm3, %v1691_v26, %v1703_v38  ;;  %v80_v26 = vsel %vm79_vm4, %v1709_v45, %v1707_v44  ;;  %v648_v44 = vsel %vm594_vm2, %v646_v29, %v647_v32 }
  0x95   :  { %v59_v38 = vadd.f32 %v55_v23, %v28_v20  ;;  %v669_v45 = vmul.f32 %v667_v36, %v1728_v39 }
  0x96   :  { %v1719_v52 = vpop.permute.xlu1 %77  ;;  %v1721_v53 = vpop.permute.xlu0 %75 }
  0x97   :  { %v84_v47 = vadd.f32 %v80_v26, %v59_v38  ;;  %v679_v62 = vrot.slane %v669_v45, 3  ;;  %v729_v26 = vmul.f32 %v727_v1, %v1728_v39  ;;  %v731_v38 = vmul.f32 %v727_v1, %v1733_v43 }
  0x98   :  { %544 = vrot.lane.b32.xlu1 %v541_v48, %s1477_s4  ;;  %542 = vrot.lane.b32.xlu0 %v538_v49, %s1477_s4  ;;  %v671_v49 = vmul.f32 %v667_v36, %v1733_v43 }
  0x9a   :  { %v99_v57 = vpop.permute.xlu1 %98  ;;  %v97_v58 = vpop.permute.xlu0 %96 }
  0x9c   :  { %548 = vrot.lane.b32.xlu1 %v540_v40, %s1477_s4  ;;  %546 = vrot.lane.b32.xlu0 %v537_v42, %s1477_s4  ;;  %v105_v40 = vsel %vm104_vm5, %v97_v58, %v99_v57  ;;  %v190_v42 = vmul.f32 %v189_v35, %v187_v28  ;;  %v196_v57 = vrot.slane %v1804_v46, 1  ;;  %v707_v28 = vrot.slane %v700_v17, 3 }
  0x9d   :  { %v109_v33 = vadd.f32 %v105_v40, %v84_v47  ;;  %v739_v47 = vrot.slane %v729_v26, 3 }
  0x9e   :  { %v1755_v4 = vpop.permute.xlu1 %102  ;;  %v1757_v5 = vpop.permute.xlu0 %100 }
  0xa0   :  { %574 = vrot.lane.b32.xlu1 %v571_v63, %s1478_s14  ;;  %572 = vrot.lane.b32.xlu0 %v568_v0, %s1478_s14  ;;  %v680_v63 = vrot.slane %v671_v49, 3  ;;  %v676_v0 = vrot.slane %v668_v50, 3 }
  0xa2   :  { %v124_v11 = vpop.permute.xlu1 %123  ;;  %v122_v12 = vpop.permute.xlu0 %121  ;;  %v681_v14 = vsel %vm594_vm2, %v679_v62, %v680_v63  ;;  %v678_v15 = vsel %vm594_vm2, %v676_v0, %v677_v2 }
  0xa3   :  { %v130_v48 = vsel %vm129_vm6, %v122_v12, %v124_v11  ;;  %v699_v11 = vmul.f32 %v697_v61, %v1728_v39  ;;  %v701_v12 = vmul.f32 %v697_v61, %v1733_v43 }
  0xa4   :  { %578 = vrot.lane.b32.xlu1 %v570_v55, %s1478_s14  ;;  %576 = vrot.lane.b32.xlu0 %v567_v56, %s1478_s14  ;;  %v195_v56 = vrot.slane %v190_v42, 1  ;;  %v134_v58 = vadd.f32 %v130_v48, %v109_v33  ;;  %v757_v42 = vstv %s1425_s5  ;;  %s1435_s5 = sld [smem:[#allocation2 + $0x25]] }
  0xa5   :  { %v709_v23 = vrot.slane %v699_v11, 3  ;;  %v710_v24 = vrot.slane %v701_v12, 3  ;;  %v759_v51 = vmul.f32 %v757_v42, %v1728_v39  ;;  %v761_v33 = vmul.f32 %v757_v42, %v1733_v43 }
  0xa6   :  { %v1779_v21 = vpop.permute.xlu1 %127  ;;  %v1781_v22 = vpop.permute.xlu0 %125  ;;  %v760_v61 = vmul.f32 %v757_v42, %v1743_v60 }
  0xa7   :  { %v711_v35 = vsel %vm594_vm2, %v709_v23, %v710_v24  ;;  %v769_v0 = vrot.slane %v759_v51, 3  ;;  %v770_v39 = vrot.slane %v761_v33, 3 }
  0xa8   :  { %624 = vrot.lane.b32.xlu1 %v621_v18, %s1473_s23  ;;  %622 = vrot.lane.b32.xlu0 %v618_v19, %s1473_s23 }
  0xaa   :  { %v149_v30 = vpop.permute.xlu1 %148  ;;  %v147_v31 = vpop.permute.xlu0 %146 }
  0xab   :  { %v155_v34 = vsel %vm154_vm7, %v147_v31, %v149_v30  ;;  %v728_v30 = vmul.f32 %v727_v1, %v1738_v59  ;;  %v730_v31 = vmul.f32 %v727_v1, %v1743_v60 }
  0xac   :  { %628 = vrot.lane.b32.xlu1 %v620_v8, %s1473_s23  ;;  %626 = vrot.lane.b32.xlu0 %v617_v10, %s1473_s23  ;;  %v159_v3 = vadd.f32 %v155_v34, %v134_v58  ;;  %v197_v8 = vsel %vm194_vm0, %v195_v56, %v196_v57  ;;  %v758_v58 = vmul.f32 %v757_v42, %v1738_v59  ;;  %v807_v59 = vstv %s1427_s6 }
  0xad   :  { %v736_v45 = vrot.slane %v728_v30, 3  ;;  %v737_v48 = vrot.slane %v730_v31, 3 }
  0xae   :  { %v1814_v54 = vpop.permute.xlu1 %152  ;;  %v1816_v55 = vpop.permute.xlu0 %150  ;;  %v766_v43 = vrot.slane %v758_v58, 3 }
  0xaf   :  { %v738_v56 = vsel %vm594_vm2, %v736_v45, %v737_v48 }
  0xb0   :  { %654 = vrot.lane.b32.xlu1 %v651_v41, %s1474_s25  ;;  %652 = vrot.lane.b32.xlu0 %v648_v44, %s1474_s25  ;;  %v740_v44 = vrot.slane %v731_v38, 3 }
  0xb2   :  { %v174_v6 = vpop.permute.xlu1 %173  ;;  %v172_v7 = vpop.permute.xlu0 %171  ;;  %v741_v34 = vsel %vm594_vm2, %v739_v47, %v740_v44 }
  0xb3   :  { %v180_v9 = vsel %vm179_vm8, %v172_v7, %v174_v6  ;;  %v1887_v7 = vld [vmem:[%s2388_s1 + $0x18] sm:$0x3f] }
  0xb4   :  { %v184_v10 = vadd.f32 %v180_v9, %v159_v3  ;;  %658 = vrot.lane.b32.xlu1 %v650_v27, %s1474_s25  ;;  %656 = vrot.lane.b32.xlu0 %v647_v32, %s1474_s25  ;;  %v706_v27 = vrot.slane %v698_v16, 3  ;;  %v1882_v3 = vld [vmem:[%s2388_s1 + $0x8] sm:$0xf0]  ;;  %v1897_v9 = vld [vmem:[%s2388_s1 + $0x10] sm:$0x3f] }
  0xb5   :  { %v809_v11 = vmul.f32 %v807_v59, %v1882_v3  ;;  %v810_v16 = vmul.f32 %v807_v59, %v1897_v9 }
  0xb6   :  { %v1835_v18 = vadd.f32 %v197_v8, %v184_v10  ;;  %v1837_v19 = vpop.permute.xlu1 %177  ;;  %v1839_v20 = vpop.permute.xlu0 %175  ;;  %v708_v36 = vsel %vm594_vm2, %v706_v27, %v707_v28  ;;  %v1892_v8 = vld [vmem:[%s2388_s1] sm:$0xf0]  ;;  %v771_v10 = vsel %vm594_vm2, %v769_v0, %v770_v39  ;;  %v388_v0 = vld [vmem:[%s2388_s1 + $0x10] sm:$0xf] }
  0xb7   :  { %v819_v27 = vrot.slane %v809_v11, 4 }
  0xb8   :  { %684 = vrot.lane.b32.xlu1 %v681_v14, %s1475_s27  ;;  %682 = vrot.lane.b32.xlu0 %v678_v15, %s1475_s27  ;;  %v811_v14 = vmul.f32 %v807_v59, %v1887_v7  ;;  %v808_v15 = vmul.f32 %v807_v59, %v1892_v8 }
  0xba   :  { %v1843_v29 = vpop.permute.xlu1 %224  ;;  %v1845_v32 = vpop.permute.xlu0 %222  ;;  %v816_v1 = vrot.slane %v808_v15, 4 }
  0xbb   :  { %v230_v51 = vsel %vm54_vm3, %v1845_v32, %v1843_v29  ;;  %v867_v32 = vstv %s1429_s0 }
  0xbc   :  { %688 = vrot.lane.b32.xlu1 %v680_v63, %s1475_s27  ;;  %686 = vrot.lane.b32.xlu0 %v677_v2, %s1475_s27  ;;  %v767_v2 = vrot.slane %v760_v61, 3 }
  0xbe   :  { %v1855_v40 = vpop.permute.xlu1 %228  ;;  %v1857_v41 = vpop.permute.xlu0 %226  ;;  %v768_v12 = vsel %vm594_vm2, %v766_v43, %v767_v2  ;;  %v234_v43 = vadd.f32 %v230_v51, %v1835_v18 }
  0xc0   :  { %714 = vrot.lane.b32.xlu1 %v711_v35, %s1476_s29  ;;  %712 = vrot.lane.b32.xlu0 %v708_v36, %s1476_s29  ;;  %v817_v35 = vrot.slane %v810_v16, 4 }
  0xc2   :  { %v1861_v49 = vpop.permute.xlu1 %254  ;;  %v1863_v50 = vpop.permute.xlu0 %252 }
  0xc3   :  { %v260_v29 = vsel %vm79_vm4, %v1863_v50, %v1861_v49  ;;  %v869_v49 = vmul.f32 %v867_v32, %v1882_v3  ;;  %v871_v50 = vmul.f32 %v867_v32, %v1887_v7 }
  0xc4   :  { %718 = vrot.lane.b32.xlu1 %v710_v24, %s1476_s29  ;;  %716 = vrot.lane.b32.xlu0 %v707_v28, %s1476_s29  ;;  %v837_v24 = vstv %s1428_s7  ;;  %v820_v28 = vrot.slane %v811_v14, 4  ;;  %v264_v15 = vadd.f32 %v260_v29, %v234_v43 }
  0xc5   :  { %v839_v38 = vmul.f32 %v837_v24, %v1882_v3  ;;  %v841_v30 = vmul.f32 %v837_v24, %v1887_v7  ;;  %v838_v31 = vmul.f32 %v837_v24, %v1892_v8  ;;  %v840_v42 = vmul.f32 %v837_v24, %v1897_v9 }
  0xc6   :  { %v1873_v62 = vpop.permute.xlu1 %258  ;;  %v1875_v63 = vpop.permute.xlu0 %256  ;;  %v821_v47 = vsel %vm794_vm9, %v819_v27, %v820_v28 }
  0xc7   :  { %v849_v33 = vrot.slane %v839_v38, 4  ;;  %v846_v58 = vrot.slane %v838_v31, 4  ;;  %v847_v61 = vrot.slane %v840_v42, 4  ;;  %v880_v31 = vrot.slane %v871_v50, 4 }
  0xc8   :  { %744 = vrot.lane.b32.xlu1 %v741_v34, %s1477_s4  ;;  %742 = vrot.lane.b32.xlu0 %v738_v56, %s1477_s4  ;;  %v850_v34 = vrot.slane %v841_v30, 4  ;;  %v387_v56 = vld [vmem:[%s2388_s1] sm:$0xfc] }
  0xc9   :  { %v848_v16 = vsel %vm794_vm9, %v846_v58, %v847_v61 }
  0xca   :  { %v285_v60 = vpop.permute.xlu1 %284  ;;  %v283_v6 = vpop.permute.xlu0 %282  ;;  %v851_v11 = vsel %vm794_vm9, %v849_v33, %v850_v34 }
  0xcc   :  { %748 = vrot.lane.b32.xlu1 %v740_v44, %s1477_s4  ;;  %746 = vrot.lane.b32.xlu0 %v737_v48, %s1477_s4  ;;  %v818_v44 = vsel %vm794_vm9, %v816_v1, %v817_v35 }
  0xce   :  { %v1907_v17 = vpop.permute.xlu1 %288  ;;  %v1909_v23 = vpop.permute.xlu0 %286 }
  0xcf   :  { %v291_v46 = vsel %vm104_vm5, %v1909_v23, %v1907_v17 }
  0xd0   :  { %774 = vrot.lane.b32.xlu1 %v771_v10, %s1478_s14  ;;  %772 = vrot.lane.b32.xlu0 %v768_v12, %s1478_s14  ;;  %v290_v10 = vsel %vm104_vm5, %v283_v6, %v285_v60  ;;  %v868_v60 = vmul.f32 %v867_v32, %v1892_v8  ;;  %v870_v6 = vmul.f32 %v867_v32, %v1897_v9 }
  0xd1   :  { %v294_v24 = vadd.f32 %v290_v10, %v264_v15 }
  0xd2   :  { %v315_v26 = vpop.permute.xlu1 %314  ;;  %v313_v36 = vpop.permute.xlu0 %312  ;;  %v876_v42 = vrot.slane %v868_v60, 4 }
  0xd3   :  { %v320_v18 = vsel %vm129_vm6, %v313_v36, %v315_v26  ;;  %v897_v26 = vstv %s1430_s24  ;;  %v879_v36 = vrot.slane %v869_v49, 4  ;;  %s1439_s24 = sld [smem:[#allocation2 + $0x29]] }
  0xd4   :  { %778 = vrot.lane.b32.xlu1 %v770_v39, %s1478_s14  ;;  %776 = vrot.lane.b32.xlu0 %v767_v2, %s1478_s14  ;;  %v389_v39 = vstv %s1913_s17  ;;  %v324_v30 = vadd.f32 %v320_v18, %v294_v24  ;;  %v898_v32 = vmul.f32 %v897_v26, %v1892_v8  ;;  %v900_v43 = vmul.f32 %v897_v26, %v1897_v9  ;;  %s2124_s17 = sld [smem:[#allocation2 + $0x27]] }
  0xd5   :  { %v390_v12 = vmul.f32 %v389_v39, %v387_v56  ;;  %v1945_v14 = vmul.f32 %v389_v39, %v388_v0  ;;  %v899_v0 = vmul.f32 %v897_v26, %v1882_v3  ;;  %v901_v39 = vmul.f32 %v897_v26, %v1887_v7 }
  0xd6   :  { %v1923_v45 = vpop.permute.xlu1 %318  ;;  %v1925_v48 = vpop.permute.xlu0 %316  ;;  %v907_v49 = vrot.slane %v900_v43, 4  ;;  %v927_v18 = vstv %s1431_s26  ;;  %s1441_s26 = sld [smem:[#allocation2 + $0x2b]] }
  0xd7   :  { %v396_v38 = vrot.slane %v1945_v14, 2  ;;  %v910_v15 = vrot.slane %v901_v39, 4  ;;  %v931_v26 = vmul.f32 %v927_v18, %v1887_v7 }
  0xd8   :  { %824 = vrot.lane.b32.xlu1 %v821_v47, %s1473_s23  ;;  %822 = vrot.lane.b32.xlu0 %v818_v44, %s1473_s23  ;;  %v877_v47 = vrot.slane %v870_v6, 4 }
  0xda   :  { %v345_v2 = vpop.permute.xlu1 %344  ;;  %v343_v59 = vpop.permute.xlu0 %342 }
  0xdc   :  { %828 = vrot.lane.b32.xlu1 %v820_v28, %s1473_s23  ;;  %826 = vrot.lane.b32.xlu0 %v817_v35, %s1473_s23  ;;  %v350_v28 = vsel %vm154_vm7, %v343_v59, %v345_v2  ;;  %v395_v35 = vrot.slane %v390_v12, 2  ;;  %v881_v2 = vsel %vm794_vm9, %v879_v36, %v880_v31  ;;  %v878_v59 = vsel %vm794_vm9, %v876_v42, %v877_v47 }
  0xdd   :  { %v354_v44 = vadd.f32 %v350_v28, %v324_v30  ;;  %v56_v30 = vsel %vm54_vm3, %v1689_v25, %v1701_v37  ;;  %v928_v36 = vmul.f32 %v927_v18, %v1892_v8  ;;  %v957_v37 = vstv %s1432_s3 }
  0xde   :  { %v1955_v27 = vpop.permute.xlu1 %348  ;;  %v1957_v1 = vpop.permute.xlu0 %346  ;;  %v397_v58 = vsel %vm394_vm1, %v395_v35, %v396_v38  ;;  %v929_v35 = vmul.f32 %v927_v18, %v1882_v3 }
  0xe0   :  { %854 = vrot.lane.b32.xlu1 %v851_v11, %s1474_s25  ;;  %852 = vrot.lane.b32.xlu0 %v848_v16, %s1474_s25  ;;  %v906_v16 = vrot.slane %v898_v32, 4  ;;  %v939_v25 = vrot.slane %v929_v35, 4  ;;  %v961_v32 = vmul.f32 %v957_v37, %v1887_v7 }
  0xe2   :  { %v375_v51 = vpop.permute.xlu1 %374  ;;  %v373_v33 = vpop.permute.xlu0 %372  ;;  %v908_v28 = vsel %vm794_vm9, %v906_v16, %v907_v49  ;;  %v1007_v16 = vstv %s1434_s19 }
  0xe3   :  { %v380_v56 = vsel %vm179_vm8, %v373_v33, %v375_v51  ;;  %v106_v51 = vsel %vm104_vm5, %v1757_v5, %v1755_v4  ;;  %v940_v33 = vrot.slane %v931_v26, 4  ;;  %v958_v4 = vmul.f32 %v957_v37, %v1892_v8 }
  0xe4   :  { %v384_v29 = vadd.f32 %v380_v56, %v354_v44  ;;  %858 = vrot.lane.b32.xlu1 %v850_v34, %s1474_s25  ;;  %856 = vrot.lane.b32.xlu0 %v847_v61, %s1474_s25  ;;  %v26_v34 = vld [vmem:[%s2388_s1 + $0x10] sm:$0x3]  ;;  %v909_v61 = vrot.slane %v899_v0, 4  ;;  %v936_v56 = vrot.slane %v928_v36, 4  ;;  %v960_v5 = vmul.f32 %v957_v37, %v1897_v9 }
  0xe5   :  { %v29_v6 = vmul.f32 %v27_v13, %v26_v34  ;;  %v930_v13 = vmul.f32 %v927_v18, %v1897_v9  ;;  %v181_v34 = vsel %vm179_vm8, %v1839_v20, %v1837_v19  ;;  %v2054_v20 = vld [vmem:[%s2388_s1 + $0x18] sm:$0x7f]  ;;  %v231_v26 = vsel %vm54_vm3, %v1857_v41, %v1855_v40 }
  0xe6   :  { %v1975_v10 = vpop.permute.xlu1 %378  ;;  %v1977_v11 = vpop.permute.xlu0 %376  ;;  %v1979_v12 = vadd.f32 %v397_v58, %v384_v29  ;;  %v911_v24 = vsel %vm794_vm9, %v909_v61, %v910_v15  ;;  %v967_v9 = vrot.slane %v960_v5, 4  ;;  %v1011_v36 = vmul.f32 %v1007_v16, %v2054_v20 }
  0xe7   :  { %v60_v44 = vadd.f32 %v56_v30, %v29_v6  ;;  %v937_v58 = vrot.slane %v930_v13, 4  ;;  %v2059_v6 = vld [vmem:[%s2388_s1] sm:$0xe0] }
  0xe8   :  { %884 = vrot.lane.b32.xlu1 %v881_v2, %s1475_s27  ;;  %882 = vrot.lane.b32.xlu0 %v878_v59, %s1475_s27  ;;  %v156_v2 = vsel %vm154_vm7, %v1816_v55, %v1814_v54  ;;  %v941_v59 = vsel %vm794_vm9, %v939_v25, %v940_v33  ;;  %v970_v54 = vrot.slane %v961_v32, 4  ;;  %v966_v55 = vrot.slane %v958_v4, 4 }
  0xe9   :  { %v1008_v13 = vmul.f32 %v1007_v16, %v2059_v6 }
  0xea   :  { %v1986_v50 = vpop.permute.xlu1 %424  ;;  %v1988_v60 = vpop.permute.xlu0 %422  ;;  %v968_v35 = vsel %vm794_vm9, %v966_v55, %v967_v9 }
  0xec   :  { %888 = vrot.lane.b32.xlu1 %v880_v31, %s1475_s27  ;;  %886 = vrot.lane.b32.xlu0 %v877_v47, %s1475_s27  ;;  %v81_v47 = vsel %vm79_vm4, %v1721_v53, %v1719_v52  ;;  %v131_v52 = vsel %vm129_vm6, %v1781_v22, %v1779_v21  ;;  %v959_v53 = vmul.f32 %v957_v37, %v1882_v3 }
  0xed   :  { %v85_v0 = vadd.f32 %v81_v47, %v60_v44  ;;  %v938_v21 = vsel %vm794_vm9, %v936_v56, %v937_v58  ;;  %v1016_v56 = vrot.slane %v1008_v13, 5 }
  0xee   :  { %v2003_v42 = vpop.permute.xlu1 %428  ;;  %v2005_v31 = vpop.permute.xlu0 %426  ;;  %v969_v8 = vrot.slane %v959_v53, 4 }
  0xef   :  { %v110_v43 = vadd.f32 %v106_v51, %v85_v0  ;;  %v261_v51 = vsel %vm79_vm4, %v1875_v63, %v1873_v62  ;;  %v321_v62 = vsel %vm129_vm6, %v1925_v48, %v1923_v45  ;;  %v351_v45 = vsel %vm154_vm7, %v1957_v1, %v1955_v27 }
  0xf0   :  { %914 = vrot.lane.b32.xlu1 %v911_v24, %s1476_s29  ;;  %912 = vrot.lane.b32.xlu0 %v908_v28, %s1476_s29  ;;  %v2064_v24 = vld [vmem:[%s2388_s1 + $0x10] sm:$0x7f]  ;;  %v971_v28 = vsel %vm794_vm9, %v969_v8, %v970_v54 }
  0xf1   :  { %v135_v22 = vadd.f32 %v131_v52, %v110_v43  ;;  %v1010_v47 = vmul.f32 %v1007_v16, %v2064_v24 }
  0xf2   :  { %v2015_v39 = vpop.permute.xlu1 %454  ;;  %v2017_v29 = vpop.permute.xlu0 %452 }
  0xf3   :  { %v160_v61 = vadd.f32 %v156_v2, %v135_v22 }
  0xf4   :  { %918 = vrot.lane.b32.xlu1 %v910_v15, %s1476_s29  ;;  %916 = vrot.lane.b32.xlu0 %v907_v49, %s1476_s29  ;;  %v2045_v15 = vld [vmem:[%s2388_s1 + $0x8] sm:$0xe0] }
  0xf5   :  { %v185_v49 = vadd.f32 %v181_v34, %v160_v61  ;;  %v1009_v30 = vmul.f32 %v1007_v16, %v2045_v15  ;;  %v1067_v34 = vstv %s2086_s15 }
  0xf6   :  { %v2033_v3 = vpop.permute.xlu1 %458  ;;  %v2035_v7 = vpop.permute.xlu0 %456  ;;  %v2128_v16 = vmul.f32 %v1067_v34, %v2054_v20 }
  0xf7   :  { %v201_v44 = vadd.f32 %v196_v57, %v185_v49  ;;  %v1019_v41 = vrot.slane %v1009_v30, 5  ;;  %v1020_v57 = vrot.slane %v1011_v36, 5  ;;  %v587_v49 = vld [vmem:[%s2388_s1] sm:$0xf8]  ;;  %v2142_v30 = vmul.f32 %v1067_v34, %v2064_v24 }
  0xf8   :  { %944 = vrot.lane.b32.xlu1 %v941_v59, %s1477_s4  ;;  %942 = vrot.lane.b32.xlu0 %v938_v21, %s1477_s4  ;;  %v381_v21 = vsel %vm179_vm8, %v1977_v11, %v1975_v10 }
  0xf9   :  { %v235_v40 = vadd.f32 %v231_v26, %v201_v44  ;;  %v1021_v48 = vsel %vm994_vm10, %v1019_v41, %v1020_v57 }
  0xfa   :  { %v2047_v18 = vpop.permute.xlu1 %484  ;;  %v2049_v19 = vpop.permute.xlu0 %482 }
  0xfb   :  { %v265_v0 = vadd.f32 %v261_v51, %v235_v40 }
  0xfc   :  { %948 = vrot.lane.b32.xlu1 %v940_v33, %s1477_s4  ;;  %946 = vrot.lane.b32.xlu0 %v937_v58, %s1477_s4  ;;  %v1037_v33 = vstv %s1435_s5  ;;  %v1017_v58 = vrot.slane %v1010_v47, 5  ;;  %v431_v47 = vsel %vm54_vm3, %v2005_v31, %v2003_v42  ;;  %v461_v42 = vsel %vm79_vm4, %v2035_v7, %v2033_v3 }
  0xfd   :  { %v1039_v63 = vmul.f32 %v1037_v33, %v2045_v15  ;;  %v2100_v32 = vmul.f32 %v1037_v33, %v2054_v20  ;;  %v295_v17 = vadd.f32 %v291_v46, %v265_v0  ;;  %v1038_v23 = vmul.f32 %v1037_v33, %v2059_v6 }
  0xfe   :  { %v2079_v25 = vpop.permute.xlu1 %488  ;;  %v2081_v37 = vpop.permute.xlu0 %486  ;;  %v2106_v43 = vmul.f32 %v1037_v33, %v2064_v24  ;;  %v1018_v4 = vsel %vm994_vm10, %v1016_v56, %v1017_v58  ;;  %v1080_v46 = vrot.slane %v2128_v16, 5 }
  0xff   :  { %v325_v5 = vadd.f32 %v321_v62, %v295_v17  ;;  %v1049_v22 = vrot.slane %v1039_v63, 5  ;;  %v1050_v27 = vrot.slane %v2100_v32, 5  ;;  %v1046_v1 = vrot.slane %v1038_v23, 5 }
 0x100   :  { %974 = vrot.lane.b32.xlu1 %v971_v28, %s1478_s14  ;;  %972 = vrot.lane.b32.xlu0 %v968_v35, %s1478_s14  ;;  %v1047_v61 = vrot.slane %v2106_v43, 5  ;;  %v588_v28 = vld [vmem:[%s2388_s1 + $0x10] sm:$0x1f]  ;;  %v589_v35 = vstv %s2093_s16  ;;  %v491_v14 = vsel %vm104_vm5, %v2081_v37, %v2079_v25 }
 0x101   :  { %v355_v8 = vadd.f32 %v351_v45, %v325_v5  ;;  %v1051_v36 = vsel %vm994_vm10, %v1049_v22, %v1050_v27  ;;  %v2155_v44 = vmul.f32 %v589_v35, %v588_v28 }
 0x102   :  { %v515_v52 = vpop.permute.xlu1 %514  ;;  %v513_v53 = vpop.permute.xlu0 %512  ;;  %v1048_v13 = vsel %vm994_vm10, %v1046_v1, %v1047_v61 }
 0x103   :  { %v385_v10 = vadd.f32 %v381_v21, %v355_v8  ;;  %v520_v31 = vsel %vm129_vm6, %v513_v53, %v515_v52  ;;  %v596_v62 = vrot.slane %v2155_v44, 3 }
 0x104   :  { %978 = vrot.lane.b32.xlu1 %v970_v54, %s1478_s14  ;;  %976 = vrot.lane.b32.xlu0 %v967_v9, %s1478_s14  ;;  %v430_v54 = vsel %vm54_vm3, %v1988_v60, %v1986_v50  ;;  %v1069_v9 = vmul.f32 %v1067_v34, %v2045_v15  ;;  %v460_v50 = vsel %vm79_vm4, %v2017_v29, %v2015_v39 }
 0x105   :  { %v1068_v60 = vmul.f32 %v1067_v34, %v2059_v6  ;;  %v434_v26 = vadd.f32 %v430_v54, %v1979_v12  ;;  %v490_v39 = vsel %vm104_vm5, %v2049_v19, %v2047_v18  ;;  %v590_v29 = vmul.f32 %v589_v35, %v587_v49 }
 0x106   :  { %v519_v2 = vpop.permute.xlu1 %518  ;;  %v517_v59 = vpop.permute.xlu0 %516  ;;  %v401_v12 = vadd.f32 %v396_v38, %v385_v10  ;;  %v1079_v33 = vrot.slane %v1069_v9, 5  ;;  %v1077_v19 = vrot.slane %v2142_v30, 5 }
 0x107   :  { %v464_v51 = vadd.f32 %v460_v50, %v434_v26  ;;  %v1076_v18 = vrot.slane %v1068_v60, 5  ;;  %v595_v53 = vrot.slane %v590_v29, 3  ;;  %v521_v63 = vsel %vm129_vm6, %v517_v59, %v519_v2 }
 0x108   :  { %1024 = vrot.lane.b32.xlu1 %v1021_v48, %s1473_s23  ;;  %1022 = vrot.lane.b32.xlu0 %v1018_v4, %s1473_s23  ;;  %v1081_v17 = vsel %vm994_vm10, %v1079_v33, %v1080_v46 }
 0x109   :  { %v494_v56 = vadd.f32 %v490_v39, %v464_v51  ;;  %v1078_v25 = vsel %vm994_vm10, %v1076_v18, %v1077_v19  ;;  %v597_v8 = vsel %vm594_vm2, %v595_v53, %v596_v62  ;;  %v2216_v53 = vld [vmem:[%s2388_s1 + $0x8] sm:$0xc0] }
 0x10a   :  { %v545_v11 = vpop.permute.xlu1 %544  ;;  %v543_v55 = vpop.permute.xlu0 %542 }
 0x10b   :  { %v550_v38 = vsel %vm154_vm7, %v543_v55, %v545_v11  ;;  %v524_v7 = vadd.f32 %v520_v31, %v494_v56  ;;  %v1127_v11 = vstv %s2172_s22 }
 0x10c   :  { %1028 = vrot.lane.b32.xlu1 %v1020_v57, %s1473_s23  ;;  %1026 = vrot.lane.b32.xlu0 %v1017_v58, %s1473_s23  ;;  %v435_v57 = vadd.f32 %v431_v47, %v401_v12  ;;  %v1097_v58 = vstv %s2124_s17  ;;  %v1129_v50 = vmul.f32 %v1127_v11, %v2045_v15  ;;  %v1131_v60 = vmul.f32 %v1127_v11, %v2054_v20 }
 0x10d   :  { %v554_v23 = vadd.f32 %v550_v38, %v524_v7  ;;  %v1099_v43 = vmul.f32 %v1097_v58, %v2045_v15  ;;  %v1101_v48 = vmul.f32 %v1097_v58, %v2054_v20  ;;  %v1098_v4 = vmul.f32 %v1097_v58, %v2059_v6 }
 0x10e   :  { %v549_v40 = vpop.permute.xlu1 %548  ;;  %v547_v41 = vpop.permute.xlu0 %546  ;;  %v465_v3 = vadd.f32 %v461_v42, %v435_v57  ;;  %v1100_v5 = vmul.f32 %v1097_v58, %v2064_v24  ;;  %v1139_v51 = vrot.slane %v1129_v50, 5 }
 0x10f   :  { %v551_v45 = vsel %vm154_vm7, %v547_v41, %v549_v40  ;;  %v1109_v1 = vrot.slane %v1099_v43, 5  ;;  %v1106_v54 = vrot.slane %v1098_v4, 5  ;;  %v1140_v40 = vrot.slane %v1131_v60, 5 }
 0x110   :  { %1054 = vrot.lane.b32.xlu1 %v1051_v36, %s1474_s25  ;;  %1052 = vrot.lane.b32.xlu0 %v1048_v13, %s1474_s25  ;;  %v495_v37 = vadd.f32 %v491_v14, %v465_v3  ;;  %v1107_v10 = vrot.slane %v1100_v5, 5  ;;  %v1128_v36 = vmul.f32 %v1127_v11, %v2059_v6  ;;  %v1130_v13 = vmul.f32 %v1127_v11, %v2064_v24 }
 0x111   :  { %v1141_v57 = vsel %vm994_vm10, %v1139_v51, %v1140_v40 }
 0x112   :  { %v575_v0 = vpop.permute.xlu1 %574  ;;  %v573_v52 = vpop.permute.xlu0 %572  ;;  %v525_v2 = vadd.f32 %v521_v63, %v495_v37  ;;  %v1108_v26 = vsel %vm994_vm10, %v1106_v54, %v1107_v10  ;;  %v1136_v41 = vrot.slane %v1128_v36, 5  ;;  %v1137_v33 = vrot.slane %v1130_v13, 5 }
 0x113   :  { %v580_v32 = vsel %vm179_vm8, %v573_v52, %v575_v0 }
 0x114   :  { %1058 = vrot.lane.b32.xlu1 %v1050_v27, %s1474_s25  ;;  %1056 = vrot.lane.b32.xlu0 %v1047_v61, %s1474_s25  ;;  %v584_v59 = vadd.f32 %v580_v32, %v554_v23  ;;  %v555_v27 = vadd.f32 %v551_v45, %v525_v2  ;;  %v1110_v61 = vrot.slane %v1101_v48, 5  ;;  %v1138_v14 = vsel %vm994_vm10, %v1136_v41, %v1137_v33 }
 0x116   :  { %v579_v21 = vpop.permute.xlu1 %578  ;;  %v577_v22 = vpop.permute.xlu0 %576  ;;  %v600_v49 = vadd.f32 %v597_v8, %v584_v59  ;;  %v1111_v30 = vsel %vm994_vm10, %v1109_v1, %v1110_v61 }
 0x117   :  { %v581_v34 = vsel %vm179_vm8, %v577_v22, %v579_v21 }
 0x118   :  { %1084 = vrot.lane.b32.xlu1 %v1081_v17, %s1475_s27  ;;  %1082 = vrot.lane.b32.xlu0 %v1078_v25, %s1475_s27  ;;  %v585_v55 = vadd.f32 %v581_v34, %v555_v27  ;;  %v2228_v17 = vld [vmem:[%s2388_s1] sm:$0xc0]  ;;  %v2233_v25 = vld [vmem:[%s2388_s1 + $0x10] sm:$0xff] }
 0x11a   :  { %v625_v9 = vpop.permute.xlu1 %624  ;;  %v623_v16 = vpop.permute.xlu0 %622  ;;  %v601_v29 = vadd.f32 %v596_v62, %v585_v55 }
 0x11b   :  { %v630_v28 = vsel %vm54_vm3, %v623_v16, %v625_v9  ;;  %v1237_v9 = vstv %s1442_s9 }
 0x11c   :  { %v634_v35 = vadd.f32 %v630_v28, %v600_v49  ;;  %1088 = vrot.lane.b32.xlu1 %v1080_v46, %s1475_s27  ;;  %1086 = vrot.lane.b32.xlu0 %v1077_v19, %s1475_s27  ;;  %v1157_v46 = vstv %s1439_s24  ;;  %v1239_v50 = vmul.f32 %v1237_v9, %v2216_v53 }
 0x11d   :  { %v1159_v56 = vmul.f32 %v1157_v46, %v2045_v15  ;;  %v1161_v38 = vmul.f32 %v1157_v46, %v2054_v20  ;;  %v1158_v58 = vmul.f32 %v1157_v46, %v2059_v6  ;;  %v1160_v3 = vmul.f32 %v1157_v46, %v2064_v24  ;;  %v2223_v20 = vld [vmem:[%s2388_s1 + $0x18] sm:$0xff] }
 0x11e   :  { %v629_v47 = vpop.permute.xlu1 %628  ;;  %v627_v39 = vpop.permute.xlu0 %626  ;;  %v1207_v6 = vstv %s1441_s26  ;;  %v1241_v60 = vmul.f32 %v1237_v9, %v2223_v20 }
 0x11f   :  { %v631_v44 = vsel %vm54_vm3, %v627_v39, %v629_v47  ;;  %v1169_v15 = vrot.slane %v1159_v56, 5  ;;  %v1170_v24 = vrot.slane %v1161_v38, 5  ;;  %v1166_v63 = vrot.slane %v1158_v58, 5 }
 0x120   :  { %v635_v12 = vadd.f32 %v631_v44, %v601_v29  ;;  %1114 = vrot.lane.b32.xlu1 %v1111_v30, %s1476_s29  ;;  %1112 = vrot.lane.b32.xlu0 %v1108_v26, %s1476_s29  ;;  %v1167_v32 = vrot.slane %v1160_v3, 5  ;;  %v1209_v45 = vmul.f32 %v1207_v6, %v2216_v53  ;;  %v1211_v48 = vmul.f32 %v1207_v6, %v2223_v20 }
 0x121   :  { %v1208_v5 = vmul.f32 %v1207_v6, %v2228_v17  ;;  %v1210_v2 = vmul.f32 %v1207_v6, %v2233_v25  ;;  %v1171_v59 = vsel %vm994_vm10, %v1169_v15, %v1170_v24  ;;  %v1238_v30 = vmul.f32 %v1237_v9, %v2228_v17 }
 0x122   :  { %v655_v42 = vpop.permute.xlu1 %654  ;;  %v653_v31 = vpop.permute.xlu0 %652  ;;  %v1168_v21 = vsel %vm994_vm10, %v1166_v63, %v1167_v32  ;;  %v1219_v27 = vrot.slane %v1209_v45, 6  ;;  %v1240_v26 = vmul.f32 %v1237_v9, %v2233_v25  ;;  %v1267_v29 = vstv %s1443_s10 }
 0x123   :  { %v660_v18 = vsel %vm79_vm4, %v653_v31, %v655_v42  ;;  %v1216_v54 = vrot.slane %v1208_v5, 6  ;;  %v1249_v44 = vrot.slane %v1239_v50, 6  ;;  %v1246_v51 = vrot.slane %v1238_v30, 6 }
 0x124   :  { %v664_v19 = vadd.f32 %v660_v18, %v634_v35  ;;  %1118 = vrot.lane.b32.xlu1 %v1110_v61, %s1476_s29  ;;  %1116 = vrot.lane.b32.xlu0 %v1107_v10, %s1476_s29  ;;  %v1220_v61 = vrot.slane %v1211_v48, 6  ;;  %v1217_v10 = vrot.slane %v1210_v2, 6  ;;  %v1269_v42 = vmul.f32 %v1267_v29, %v2216_v53  ;;  %v787_v18 = vld [vmem:[%s2388_s1] sm:$0xf0] }
 0x125   :  { %v1271_v31 = vmul.f32 %v1267_v29, %v2223_v20  ;;  %v1270_v56 = vmul.f32 %v1267_v29, %v2233_v25  ;;  %v789_v38 = vstv %s2252_s11  ;;  %v1297_v45 = vstv %s1444_s12 }
 0x126   :  { %v659_v7 = vpop.permute.xlu1 %658  ;;  %v657_v0 = vpop.permute.xlu0 %656  ;;  %v1221_v28 = vsel %vm1194_vm11, %v1219_v27, %v1220_v61  ;;  %v1218_v35 = vsel %vm1194_vm11, %v1216_v54, %v1217_v10  ;;  %v790_v15 = vmul.f32 %v789_v38, %v787_v18  ;;  %v1300_v27 = vmul.f32 %v1297_v45, %v2233_v25 }
 0x127   :  { %v661_v52 = vsel %vm79_vm4, %v657_v0, %v659_v7  ;;  %v1280_v63 = vrot.slane %v1271_v31, 6 }
 0x128   :  { %v665_v62 = vadd.f32 %v661_v52, %v635_v12  ;;  %1144 = vrot.lane.b32.xlu1 %v1141_v57, %s1477_s4  ;;  %1142 = vrot.lane.b32.xlu0 %v1138_v14, %s1477_s4  ;;  %v1250_v12 = vrot.slane %v1241_v60, 6  ;;  %v1268_v57 = vmul.f32 %v1267_v29, %v2228_v17  ;;  %v788_v14 = vld [vmem:[%s2388_s1 + $0x10] sm:$0x3f] }
 0x129   :  { %v791_v6 = vmul.f32 %v789_v38, %v788_v14 }
 0x12a   :  { %v685_v37 = vpop.permute.xlu1 %684  ;;  %v683_v23 = vpop.permute.xlu0 %682  ;;  %v1251_v58 = vsel %vm1194_vm11, %v1249_v44, %v1250_v12 }
 0x12b   :  { %v690_v43 = vsel %vm104_vm5, %v683_v23, %v685_v37  ;;  %v1277_v37 = vrot.slane %v1270_v56, 6  ;;  %v796_v5 = vrot.slane %v791_v6, 4 }
 0x12c   :  { %v694_v4 = vadd.f32 %v690_v43, %v664_v19  ;;  %1148 = vrot.lane.b32.xlu1 %v1140_v40, %s1477_s4  ;;  %1146 = vrot.lane.b32.xlu0 %v1137_v33, %s1477_s4  ;;  %v1247_v40 = vrot.slane %v1240_v26, 6 }
 0x12e   :  { %v689_v22 = vpop.permute.xlu1 %688  ;;  %v687_v34 = vpop.permute.xlu0 %686  ;;  %v1248_v3 = vsel %vm1194_vm11, %v1246_v51, %v1247_v40 }
 0x12f   :  { %v691_v8 = vsel %vm104_vm5, %v687_v34, %v689_v22  ;;  %v1299_v22 = vmul.f32 %v1297_v45, %v2216_v53  ;;  %v1301_v34 = vmul.f32 %v1297_v45, %v2223_v20 }
 0x130   :  { %v695_v1 = vadd.f32 %v691_v8, %v665_v62  ;;  %1174 = vrot.lane.b32.xlu1 %v1171_v59, %s1478_s14  ;;  %1172 = vrot.lane.b32.xlu0 %v1168_v21, %s1478_s14  ;;  %v1279_v62 = vrot.slane %v1269_v42, 6  ;;  %v1298_v8 = vmul.f32 %v1297_v45, %v2228_v17 }
 0x131   :  { %v1309_v9 = vrot.slane %v1299_v22, 6 }
 0x132   :  { %v715_v11 = vpop.permute.xlu1 %714  ;;  %v713_v55 = vpop.permute.xlu0 %712  ;;  %v1281_v59 = vsel %vm1194_vm11, %v1279_v62, %v1280_v63 }
 0x133   :  { %v720_v16 = vsel %vm129_vm6, %v713_v55, %v715_v11 }
 0x134   :  { %v724_v49 = vadd.f32 %v720_v16, %v694_v4  ;;  %1178 = vrot.lane.b32.xlu1 %v1170_v24, %s1478_s14  ;;  %1176 = vrot.lane.b32.xlu0 %v1167_v32, %s1478_s14  ;;  %v1276_v32 = vrot.slane %v1268_v57, 6  ;;  %v795_v4 = vrot.slane %v790_v15, 4  ;;  %v1310_v16 = vrot.slane %v1301_v34, 6 }
 0x136   :  { %v719_v36 = vpop.permute.xlu1 %718  ;;  %v717_v13 = vpop.permute.xlu0 %716  ;;  %v1278_v21 = vsel %vm1194_vm11, %v1276_v32, %v1277_v37  ;;  %v1311_v29 = vsel %vm1194_vm11, %v1309_v9, %v1310_v16 }
 0x137   :  { %v721_v47 = vsel %vm129_vm6, %v717_v13, %v719_v36 }
 0x138   :  { %v725_v39 = vadd.f32 %v721_v47, %v695_v1  ;;  %1224 = vrot.lane.b32.xlu1 %v1221_v28, %s1473_s23  ;;  %1222 = vrot.lane.b32.xlu0 %v1218_v35, %s1473_s23  ;;  %v1307_v28 = vrot.slane %v1300_v27, 6 }
 0x13a   :  { %v745_v41 = vpop.permute.xlu1 %744  ;;  %v743_v33 = vpop.permute.xlu0 %742 }
 0x13b   :  { %v750_v46 = vsel %vm154_vm7, %v743_v33, %v745_v41 }
 0x13c   :  { %v754_v19 = vadd.f32 %v750_v46, %v724_v49  ;;  %1228 = vrot.lane.b32.xlu1 %v1220_v61, %s1473_s23  ;;  %1226 = vrot.lane.b32.xlu0 %v1217_v10, %s1473_s23  ;;  %s1445_s23 = sld [smem:[#allocation2 + $0x2f]]  ;;  %v797_v10 = vsel %vm794_vm9, %v795_v4, %v796_v5  ;;  %v1306_v49 = vrot.slane %v1298_v8, 6 }
 0x13e   :  { %v749_v7 = vpop.permute.xlu1 %748  ;;  %v747_v0 = vpop.permute.xlu0 %746  ;;  %v1308_v44 = vsel %vm1194_vm11, %v1306_v49, %v1307_v28  ;;  %v987_v49 = vld [vmem:[%s2388_s1] sm:$0xe0] }
 0x13f   :  { %v751_v52 = vsel %vm154_vm7, %v747_v0, %v749_v7 }
 0x140   :  { %v755_v24 = vadd.f32 %v751_v52, %v725_v39  ;;  %1254 = vrot.lane.b32.xlu1 %v1251_v58, %s1474_s25  ;;  %1252 = vrot.lane.b32.xlu0 %v1248_v3, %s1474_s25 }
 0x142   :  { %v775_v23 = vpop.permute.xlu1 %774  ;;  %v773_v43 = vpop.permute.xlu0 %772  ;;  %v1327_v55 = vstv %s1445_s23 }
 0x143   :  { %v780_v48 = vsel %vm179_vm8, %v773_v43, %v775_v23  ;;  %v1329_v26 = vmul.f32 %v1327_v55, %v2216_v53  ;;  %v1331_v36 = vmul.f32 %v1327_v55, %v2223_v20  ;;  %v1328_v47 = vmul.f32 %v1327_v55, %v2228_v17 }
 0x144   :  { %v784_v2 = vadd.f32 %v780_v48, %v754_v19  ;;  %1258 = vrot.lane.b32.xlu1 %v1250_v12, %s1474_s25  ;;  %1256 = vrot.lane.b32.xlu0 %v1247_v40, %s1474_s25  ;;  %s1446_s25 = sld [smem:[#allocation2 + $0x30]]  ;;  %v1330_v39 = vmul.f32 %v1327_v55, %v2233_v25 }
 0x145   :  { %v1339_v33 = vrot.slane %v1329_v26, 6  ;;  %v1340_v42 = vrot.slane %v1331_v36, 6  ;;  %v1336_v31 = vrot.slane %v1328_v47, 6 }
 0x146   :  { %v779_v1 = vpop.permute.xlu1 %778  ;;  %v777_v61 = vpop.permute.xlu0 %776  ;;  %v800_v60 = vadd.f32 %v797_v10, %v784_v2  ;;  %v1337_v18 = vrot.slane %v1330_v39, 6 }
 0x147   :  { %v781_v54 = vsel %vm179_vm8, %v777_v61, %v779_v1  ;;  %v1341_v58 = vsel %vm1194_vm11, %v1339_v33, %v1340_v42 }
 0x148   :  { %v785_v11 = vadd.f32 %v781_v54, %v755_v24  ;;  %1284 = vrot.lane.b32.xlu1 %v1281_v59, %s1475_s27  ;;  %1282 = vrot.lane.b32.xlu0 %v1278_v21, %s1475_s27  ;;  %v1338_v3 = vsel %vm1194_vm11, %v1336_v31, %v1337_v18 }
 0x14a   :  { %v825_v35 = vpop.permute.xlu1 %824  ;;  %v823_v50 = vpop.permute.xlu0 %822  ;;  %v801_v40 = vadd.f32 %v796_v5, %v785_v11  ;;  %v1357_v56 = vstv %s1446_s25 }
 0x14b   :  { %v830_v30 = vsel %vm54_vm3, %v823_v50, %v825_v35  ;;  %v1359_v7 = vmul.f32 %v1357_v56, %v2216_v53  ;;  %v1361_v0 = vmul.f32 %v1357_v56, %v2223_v20  ;;  %v1358_v52 = vmul.f32 %v1357_v56, %v2228_v17 }
 0x14c   :  { %v834_v13 = vadd.f32 %v830_v30, %v800_v60  ;;  %1288 = vrot.lane.b32.xlu1 %v1280_v63, %s1475_s27  ;;  %1286 = vrot.lane.b32.xlu0 %v1277_v37, %s1475_s27  ;;  %v1360_v62 = vmul.f32 %v1357_v56, %v2233_v25  ;;  %s1433_s27 = sld [smem:[#allocation2 + $0x23]] }
 0x14d   :  { %v1369_v32 = vrot.slane %v1359_v7, 6  ;;  %v1370_v37 = vrot.slane %v1361_v0, 6  ;;  %v1366_v23 = vrot.slane %v1358_v52, 6 }
 0x14e   :  { %v829_v12 = vpop.permute.xlu1 %828  ;;  %v827_v51 = vpop.permute.xlu0 %826  ;;  %v1367_v43 = vrot.slane %v1360_v62, 6 }
 0x14f   :  { %v831_v41 = vsel %vm54_vm3, %v827_v51, %v829_v12  ;;  %v1371_v48 = vsel %vm1194_vm11, %v1369_v32, %v1370_v37 }
 0x150   :  { %v835_v46 = vadd.f32 %v831_v41, %v801_v40  ;;  %1314 = vrot.lane.b32.xlu1 %v1311_v29, %s1476_s29  ;;  %1312 = vrot.lane.b32.xlu0 %v1308_v44, %s1476_s29  ;;  %v1368_v4 = vsel %vm1194_vm11, %v1366_v23, %v1367_v43 }
 0x152   :  { %v855_v19 = vpop.permute.xlu1 %854  ;;  %v853_v57 = vpop.permute.xlu0 %852  ;;  %v989_v35 = vstv %s1433_s27 }
 0x153   :  { %v860_v14 = vsel %vm79_vm4, %v853_v57, %v855_v19  ;;  %v990_v26 = vmul.f32 %v989_v35, %v987_v49 }
 0x154   :  { %v864_v38 = vadd.f32 %v860_v14, %v834_v13  ;;  %1318 = vrot.lane.b32.xlu1 %v1310_v16, %s1476_s29  ;;  %1316 = vrot.lane.b32.xlu0 %v1307_v28, %s1476_s29  ;;  %v988_v28 = vld [vmem:[%s2388_s1 + $0x10] sm:$0x7f] }
 0x155   :  { %v991_v36 = vmul.f32 %v989_v35, %v988_v28  ;;  %v995_v44 = vrot.slane %v990_v26, 5 }
 0x156   :  { %v859_v15 = vpop.permute.xlu1 %858  ;;  %v857_v6 = vpop.permute.xlu0 %856 }
 0x157   :  { %v861_v24 = vsel %vm79_vm4, %v857_v6, %v859_v15  ;;  %v996_v12 = vrot.slane %v991_v36, 5 }
 0x158   :  { %v865_v63 = vadd.f32 %v861_v24, %v835_v46  ;;  %1344 = vrot.lane.b32.xlu1 %v1341_v58, %s1477_s4  ;;  %1342 = vrot.lane.b32.xlu0 %v1338_v3, %s1477_s4 }
 0x159   :  { %v997_v46 = vsel %vm994_vm10, %v995_v44, %v996_v12 }
 0x15a   :  { %v885_v53 = vpop.permute.xlu1 %884  ;;  %v883_v45 = vpop.permute.xlu0 %882 }
 0x15b   :  { %v890_v20 = vsel %vm104_vm5, %v883_v45, %v885_v53 }
 0x15c   :  { %v894_v17 = vadd.f32 %v890_v20, %v864_v38  ;;  %1348 = vrot.lane.b32.xlu1 %v1340_v42, %s1477_s4  ;;  %1346 = vrot.lane.b32.xlu0 %v1337_v18, %s1477_s4 }
 0x15e   :  { %v889_v5 = vpop.permute.xlu1 %888  ;;  %v887_v2 = vpop.permute.xlu0 %886 }
 0x15f   :  { %v891_v59 = vsel %vm104_vm5, %v887_v2, %v889_v5 }
 0x160   :  { %v895_v21 = vadd.f32 %v891_v59, %v865_v63  ;;  %1374 = vrot.lane.b32.xlu1 %v1371_v48, %s1478_s14  ;;  %1372 = vrot.lane.b32.xlu0 %v1368_v4, %s1478_s14 }
 0x162   :  { %v915_v22 = vpop.permute.xlu1 %914  ;;  %v913_v34 = vpop.permute.xlu0 %912 }
 0x163   :  { %v920_v8 = vsel %vm129_vm6, %v913_v34, %v915_v22 }
 0x164   :  { %v924_v27 = vadd.f32 %v920_v8, %v894_v17  ;;  %1378 = vrot.lane.b32.xlu1 %v1370_v37, %s1478_s14  ;;  %1376 = vrot.lane.b32.xlu0 %v1367_v43, %s1478_s14  ;;  %s1440_s14 = sld [smem:[#allocation2 + $0x2a]] }
 0x166   :  { %v919_v1 = vpop.permute.xlu1 %918  ;;  %v917_v61 = vpop.permute.xlu0 %916 }
 0x167   :  { %v921_v54 = vsel %vm129_vm6, %v917_v61, %v919_v1 }
 0x168   :  { %v925_v10 = vadd.f32 %v921_v54, %v895_v21 }
 0x16a   :  { %v945_v11 = vpop.permute.xlu1 %944  ;;  %v943_v55 = vpop.permute.xlu0 %942 }
 0x16b   :  { %v950_v9 = vsel %vm154_vm7, %v943_v55, %v945_v11  ;;  %v1187_v11 = vld [vmem:[%s2388_s1] sm:$0xc0]  ;;  %v1189_v55 = vstv %s1440_s14 }
 0x16c   :  { %v954_v16 = vadd.f32 %v950_v9, %v924_v27 }
 0x16e   :  { %v949_v50 = vpop.permute.xlu1 %948  ;;  %v947_v60 = vpop.permute.xlu0 %946 }
 0x16f   :  { %v951_v30 = vsel %vm154_vm7, %v947_v60, %v949_v50  ;;  %v1190_v60 = vmul.f32 %v1189_v55, %v1187_v11 }
 0x170   :  { %v955_v13 = vadd.f32 %v951_v30, %v925_v10  ;;  %v1191_v30 = vmul.f32 %v2233_v25, %v1189_v55 }
 0x172   :  { %v975_v47 = vpop.permute.xlu1 %974  ;;  %v973_v39 = vpop.permute.xlu0 %972 }
 0x173   :  { %v980_v29 = vsel %vm179_vm8, %v973_v39, %v975_v47 }
 0x174   :  { %v984_v51 = vadd.f32 %v980_v29, %v954_v16 }
 0x176   :  { %v979_v40 = vpop.permute.xlu1 %978  ;;  %v977_v41 = vpop.permute.xlu0 %976  ;;  %v1000_v19 = vadd.f32 %v997_v46, %v984_v51 }
 0x177   :  { %v981_v33 = vsel %vm179_vm8, %v977_v41, %v979_v40  ;;  %v1195_v40 = vrot.slane %v1190_v60, 6  ;;  %v1196_v41 = vrot.slane %v1191_v30, 6 }
 0x178   :  { %v985_v42 = vadd.f32 %v981_v33, %v955_v13 }
 0x17a   :  { %v1025_v31 = vpop.permute.xlu1 %1024  ;;  %v1023_v18 = vpop.permute.xlu0 %1022  ;;  %v1001_v58 = vadd.f32 %v996_v12, %v985_v42 }
 0x17b   :  { %v1030_v57 = vsel %vm54_vm3, %v1023_v18, %v1025_v31 }
 0x17c   :  { %v1034_v56 = vadd.f32 %v1030_v57, %v1000_v19 }
 0x17e   :  { %v1029_v14 = vpop.permute.xlu1 %1028  ;;  %v1027_v38 = vpop.permute.xlu0 %1026 }
 0x17f   :  { %v1031_v3 = vsel %vm54_vm3, %v1027_v38, %v1029_v14 }
 0x180   :  { %v1035_v7 = vadd.f32 %v1031_v3, %v1001_v58 }
 0x182   :  { %v1055_v0 = vpop.permute.xlu1 %1054  ;;  %v1053_v52 = vpop.permute.xlu0 %1052 }
 0x183   :  { %v1060_v10 = vsel %vm79_vm4, %v1053_v52, %v1055_v0 }
 0x184   :  { %v1064_v28 = vadd.f32 %v1060_v10, %v1034_v56  ;;  %v1197_v56 = vsel %vm1194_vm11, %v1195_v40, %v1196_v41 }
 0x186   :  { %v1059_v62 = vpop.permute.xlu1 %1058  ;;  %v1057_v15 = vpop.permute.xlu0 %1056 }
 0x187   :  { %v1061_v35 = vsel %vm79_vm4, %v1057_v15, %v1059_v62 }
 0x188   :  { %v1065_v29 = vadd.f32 %v1061_v35, %v1035_v7 }
 0x18a   :  { %v1085_v6 = vpop.permute.xlu1 %1084  ;;  %v1083_v24 = vpop.permute.xlu0 %1082 }
 0x18b   :  { %v1090_v49 = vsel %vm104_vm5, %v1083_v24, %v1085_v6 }
 0x18c   :  { %v1094_v26 = vadd.f32 %v1090_v49, %v1064_v28 }
 0x18e   :  { %v1089_v63 = vpop.permute.xlu1 %1088  ;;  %v1087_v32 = vpop.permute.xlu0 %1086 }
 0x18f   :  { %v1091_v47 = vsel %vm104_vm5, %v1087_v32, %v1089_v63 }
 0x190   :  { %v1095_v33 = vadd.f32 %v1091_v47, %v1065_v29 }
 0x192   :  { %v1115_v37 = vpop.permute.xlu1 %1114  ;;  %v1113_v23 = vpop.permute.xlu0 %1112 }
 0x193   :  { %v1120_v50 = vsel %vm129_vm6, %v1113_v23, %v1115_v37 }
 0x194   :  { %v1124_v44 = vadd.f32 %v1120_v50, %v1094_v26 }
 0x196   :  { %v1119_v43 = vpop.permute.xlu1 %1118  ;;  %v1117_v53 = vpop.permute.xlu0 %1116 }
 0x197   :  { %v1121_v12 = vsel %vm129_vm6, %v1117_v53, %v1119_v43 }
 0x198   :  { %v1125_v18 = vadd.f32 %v1121_v12, %v1095_v33 }
 0x19a   :  { %v1145_v45 = vpop.permute.xlu1 %1144  ;;  %v1143_v20 = vpop.permute.xlu0 %1142 }
 0x19b   :  { %v1150_v39 = vsel %vm154_vm7, %v1143_v20, %v1145_v45 }
 0x19c   :  { %v1154_v46 = vadd.f32 %v1150_v39, %v1124_v44 }
 0x19e   :  { %v1149_v17 = vpop.permute.xlu1 %1148  ;;  %v1147_v48 = vpop.permute.xlu0 %1146 }
 0x19f   :  { %v1151_v25 = vsel %vm154_vm7, %v1147_v48, %v1149_v17 }
 0x1a0   :  { %v1155_v14 = vadd.f32 %v1151_v25, %v1125_v18 }
 0x1a2   :  { %v1175_v4 = vpop.permute.xlu1 %1174  ;;  %v1173_v5 = vpop.permute.xlu0 %1172 }
 0x1a3   :  { %v1180_v51 = vsel %vm179_vm8, %v1173_v5, %v1175_v4 }
 0x1a4   :  { %v1184_v19 = vadd.f32 %v1180_v51, %v1154_v46 }
 0x1a6   :  { %v1179_v2 = vpop.permute.xlu1 %1178  ;;  %v1177_v59 = vpop.permute.xlu0 %1176  ;;  %v1200_v0 = vadd.f32 %v1197_v56, %v1184_v19 }
 0x1a7   :  { %v1181_v57 = vsel %vm179_vm8, %v1177_v59, %v1179_v2 }
 0x1a8   :  { %v1185_v7 = vadd.f32 %v1181_v57, %v1155_v14 }
 0x1aa   :  { %v1225_v21 = vpop.permute.xlu1 %1224  ;;  %v1223_v22 = vpop.permute.xlu0 %1222  ;;  %v1201_v32 = vadd.f32 %v1196_v41, %v1185_v7 }
 0x1ab   :  { %v1230_v3 = vsel %vm54_vm3, %v1223_v22, %v1225_v21 }
 0x1ac   :  { %v1234_v62 = vadd.f32 %v1230_v3, %v1200_v0 }
 0x1ae   :  { %v1229_v34 = vpop.permute.xlu1 %1228  ;;  %v1227_v8 = vpop.permute.xlu0 %1226 }
 0x1af   :  { %v1231_v24 = vsel %vm54_vm3, %v1227_v8, %v1229_v34 }
 0x1b0   :  { %v1235_v53 = vadd.f32 %v1231_v24, %v1201_v32 }
 0x1b2   :  { %v1255_v27 = vpop.permute.xlu1 %1254  ;;  %v1253_v1 = vpop.permute.xlu0 %1252 }
 0x1b3   :  { %v1260_v52 = vsel %vm79_vm4, %v1253_v1, %v1255_v27 }
 0x1b4   :  { %v1264_v37 = vadd.f32 %v1260_v52, %v1234_v62 }
 0x1b6   :  { %v1259_v61 = vpop.permute.xlu1 %1258  ;;  %v1257_v54 = vpop.permute.xlu0 %1256 }
 0x1b7   :  { %v1261_v23 = vsel %vm79_vm4, %v1257_v54, %v1259_v61 }
 0x1b8   :  { %v1265_v5 = vadd.f32 %v1261_v23, %v1235_v53 }
 0x1ba   :  { %v1285_v9 = vpop.permute.xlu1 %1284  ;;  %v1283_v16 = vpop.permute.xlu0 %1282 }
 0x1bb   :  { %v1290_v63 = vsel %vm104_vm5, %v1283_v16, %v1285_v9 }
 0x1bc   :  { %v1294_v45 = vadd.f32 %v1290_v63, %v1264_v37 }
 0x1be   :  { %v1289_v36 = vpop.permute.xlu1 %1288  ;;  %v1287_v13 = vpop.permute.xlu0 %1286 }
 0x1bf   :  { %v1291_v48 = vsel %vm104_vm5, %v1287_v13, %v1289_v36 }
 0x1c0   :  { %v1295_v21 = vadd.f32 %v1291_v48, %v1265_v5 }
 0x1c2   :  { %v1315_v42 = vpop.permute.xlu1 %1314  ;;  %v1313_v31 = vpop.permute.xlu0 %1312 }
 0x1c3   :  { %v1320_v43 = vsel %vm129_vm6, %v1313_v31, %v1315_v42 }
 0x1c4   :  { %v1324_v2 = vadd.f32 %v1320_v43, %v1294_v45 }
 0x1c6   :  { %v1319_v38 = vpop.permute.xlu1 %1318  ;;  %v1317_v58 = vpop.permute.xlu0 %1316 }
 0x1c7   :  { %v1321_v59 = vsel %vm129_vm6, %v1317_v58, %v1319_v38 }
 0x1c8   :  { %v1325_v61 = vadd.f32 %v1321_v59, %v1295_v21 }
 0x1ca   :  { %v1345_v15 = vpop.permute.xlu1 %1344  ;;  %v1343_v6 = vpop.permute.xlu0 %1342 }
 0x1cb   :  { %v1350_v4 = vsel %vm154_vm7, %v1343_v6, %v1345_v15 }
 0x1cc   :  { %v1354_v22 = vadd.f32 %v1350_v4, %v1324_v2 }
 0x1ce   :  { %v1349_v20 = vpop.permute.xlu1 %1348  ;;  %v1347_v17 = vpop.permute.xlu0 %1346 }
 0x1cf   :  { %v1351_v27 = vsel %vm154_vm7, %v1347_v17, %v1349_v20 }
 0x1d0   :  { %v1355_v10 = vadd.f32 %v1351_v27, %v1325_v61 }
 0x1d2   :  { %v1375_v34 = vpop.permute.xlu1 %1374  ;;  %v1373_v8 = vpop.permute.xlu0 %1372 }
 0x1d3   :  { %v1380_v1 = vsel %vm179_vm8, %v1373_v8, %v1375_v34 }
 0x1d4   :  { %v1384_v54 = vadd.f32 %v1380_v1, %v1354_v22 }
 0x1d6   :  { %1386 = vst [vmem:[%s2389_s2] sm:$0xff] %v1384_v54  ;;  %1447 = vst [vmem:[%s2389_s2 + $0x10] sm:$0xff] %v1384_v54  ;;  %v1379_v11 = vpop.permute.xlu1 %1378  ;;  %v1377_v55 = vpop.permute.xlu0 %1376 }
 0x1d7   :  { %1449 = vst [vmem:[%s2389_s2 + $0x20] sm:$0xff] %v1384_v54  ;;  %v1381_v9 = vsel %vm179_vm8, %v1377_v55, %v1379_v11 }
 0x1d8   :  { %v1385_v16 = vadd.f32 %v1381_v9, %v1355_v10 }
 0x1da   :  { %1387 = vst [vmem:[%s2389_s2 + $0x8] sm:$0x3] %v1385_v16  ;;  %1448 = vst [vmem:[%s2389_s2 + $0x18] sm:$0x3] %v1385_v16 }
 0x1db   :  { %1450 = vst [vmem:[%s2389_s2 + $0x28] sm:$0x3] %v1385_v16 }
 0x1dc   :  { %1398 = vsyncpa [#allocation3], 1 }

</bundles_post_ra>
